<compile_context>
chip_gen: v7x
topology: tpu7x:2x2x1
jax: 0.10.0
libtpu: 0.0.40
codegen_flags: <defaults>
</compile_context>

<pallas_src>
import functools

import jax
import jax.numpy as jnp
from jax import lax
from jax.experimental import pallas as pl
from jax.experimental.pallas import tpu as pltpu


# ---------------------------------------------------------------------------
# Fused kernel: one batch element per grid step
# ---------------------------------------------------------------------------
def _fused_self_attention_kernel(
    x_ref,      # (N, C)      bf16  (batch dim squeezed)
    wqkv_ref,   # (3H, C, d)  bf16  [q heads | k heads | v heads]; scale folded into q
    bqkv_ref,   # (3H, 1, d)  f32
    pw_ref,     # (H, d, C)   bf16  per-head row blocks of proj weight
    pb_ref,     # (1, C)      f32
    o_ref,      # (N, C)      f32   (batch dim squeezed)
    *,
    num_heads: int,
):
    x = x_ref[...]                                  # (N, C) bf16, VMEM resident
    n, c = o_ref.shape
    acc = jnp.zeros((n, c), jnp.float32)            # output-projection accumulator

    # Heads are unrolled (num_heads is tiny).  Every per-head operand is a
    # leading-axis index of a pre-arranged slab -- no lane slices, no concat.
    # TODO(synk): for larger num_heads / N switch to lax.fori_loop (or a grid
    # axis over heads) plus flash-style KV tiling sized for v7x's 64 MiB VMEM.
    for h in range(num_heads):
        # Per-head projections: (N, C) @ (C, d) -> (N, d), f32 accumulation.
        # The 1/sqrt(d) scale is already folded into the q weight & bias.
        q = jnp.dot(x, wqkv_ref[h],
                    preferred_element_type=jnp.float32) + bqkv_ref[h]
        k = jnp.dot(x, wqkv_ref[num_heads + h],
                    preferred_element_type=jnp.float32) + bqkv_ref[num_heads + h]
        v = jnp.dot(x, wqkv_ref[2 * num_heads + h],
                    preferred_element_type=jnp.float32) + bqkv_ref[2 * num_heads + h]

        # Scores: q @ k^T without materializing a transposed K
        # (contract last dims of both operands -- canonical flash pattern).
        s = lax.dot_general(
            q.astype(jnp.bfloat16), k.astype(jnp.bfloat16),
            (((1,), (1,)), ((), ())),
            preferred_element_type=jnp.float32,
        )                                           # (N, N) f32

        # Softmax statistics stay in f32.
        m = jnp.max(s, axis=-1, keepdims=True)
        p = jnp.exp(s - m)
        denom = jnp.sum(p, axis=-1, keepdims=True)

        # Unnormalized PV in bf16; normalize the (N, d) result, not the
        # (N, N) probability matrix.
        pv = jnp.dot(p.astype(jnp.bfloat16), v.astype(jnp.bfloat16),
                     preferred_element_type=jnp.float32)        # (N, d)
        o_h = pv * pl.reciprocal(denom, approx=True)            # EUP slot

        # Per-head output projection accumulation replaces the lane concat:
        #   out += o_h @ proj_w[h*d:(h+1)*d, :]
        acc = acc + jnp.dot(o_h.astype(jnp.bfloat16), pw_ref[h],
                            preferred_element_type=jnp.float32)

    o_ref[...] = (acc + pb_ref[...]).astype(o_ref.dtype)


# ---------------------------------------------------------------------------
# Wrapper
# ---------------------------------------------------------------------------
def self_attention_forward(x_bhwc, params, num_heads):
    """Matches SelfAttention.forward: qkv linear -> per-head SDPA -> proj."""
    b, h, w, c = x_bhwc.shape
    n = h * w
    assert c % num_heads == 0, "features_per_token must be divisible by num_heads"
    d = c // num_heads

    # Contiguous reshape to tokens; bf16 operands halve HBM->VMEM bytes and
    # feed the MXU at native throughput (accumulation stays f32 in-kernel).
    x = x_bhwc.reshape(b, n, c).astype(jnp.bfloat16)

    # --- rearrange weights once at trace time (tiny arrays) -----------------
    # Column-layout contract: qkv_w columns follow torch's
    # reshape(b, n, 3, nH, d), i.e. col = which*C + head*d + j.
    scale = 1.0 / float(d) ** 0.5
    which_scale = jnp.array([scale, 1.0, 1.0], jnp.float32)   # fold 1/sqrt(d) into q

    wqkv = params["qkv_w"].reshape(c, 3, num_heads, d)        # (C, 3, H, d)
    wqkv = jnp.transpose(wqkv, (1, 2, 0, 3))                  # (3, H, C, d)
    wqkv = (wqkv * which_scale[:, None, None, None]).reshape(3 * num_heads, c, d)
    wqkv = wqkv.astype(jnp.bfloat16)

    bqkv = params["qkv_b"].reshape(3, num_heads, 1, d)
    bqkv = (bqkv * which_scale[:, None, None, None]).reshape(3 * num_heads, 1, d)

    pw = params["proj_w"].reshape(num_heads, d, c).astype(jnp.bfloat16)   # (H, d, C)
    pb = params["proj_b"].reshape(1, c)

    kernel = functools.partial(_fused_self_attention_kernel, num_heads=num_heads)

    # Grid over batch; with B >= 2 both v7x TensorCores get work.
    # TODO(synk): for B == 1 (or odd B) add a second parallel axis over token
    # tiles so megacore stays busy; on single-TC chips (v5e/v6e) the whole
    # batch could instead be folded into one grid step to drop the ~0.35us
    # per-step pipeline overhead.
    # TODO(synk): with C=32 the last dim fills only 32 of 128 lanes (masked
    # stores); if C is a design choice make it a multiple of 128, or present
    # x/o as lane-dense (B, N*C/128, 128) slabs and repack once in-kernel.
    out = pl.pallas_call(
        kernel,
        out_shape=jax.ShapeDtypeStruct((b, n, c), jnp.float32),
        grid=(b,),
        in_specs=[
            pl.BlockSpec((pl.Squeezed(), n, c), lambda i: (i, 0, 0)),    # x (per batch)
            pl.BlockSpec((3 * num_heads, c, d), lambda i: (0, 0, 0)),    # qkv weights
            pl.BlockSpec((3 * num_heads, 1, d), lambda i: (0, 0, 0)),    # qkv biases
            pl.BlockSpec((num_heads, d, c), lambda i: (0, 0, 0)),        # proj weight
            pl.BlockSpec((1, c), lambda i: (0, 0)),                      # proj bias
        ],
        out_specs=pl.BlockSpec((pl.Squeezed(), n, c), lambda i: (i, 0, 0)),
        compiler_params=pltpu.CompilerParams(
            dimension_semantics=("parallel",),        # megacore batch split (v7x)
            vmem_limit_bytes=32 * 1024 * 1024,        # explicit; tiny usage here
        ),
    )(x, wqkv, bqkv, pw, pb)

    return out.reshape(b, h, w, c)


# ---------------------------------------------------------------------------
# Parameters / reference
# ---------------------------------------------------------------------------
def init_params(key, features_per_token):
    """Deterministic synthetic parameters (shapes match nn.Linear weights)."""
    c = features_per_token
    k1, k2, k3, k4 = jax.random.split(key, 4)
    scale = 1.0 / jnp.sqrt(jnp.float32(c))
    return {
        # stored as (Cin, Cout) so the math is x @ w directly
        "qkv_w": jax.random.uniform(k1, (c, 3 * c), jnp.float32, -scale, scale),
        "qkv_b": jax.random.uniform(k2, (3 * c,), jnp.float32, -scale, scale),
        "proj_w": jax.random.uniform(k3, (c, c), jnp.float32, -scale, scale),
        "proj_b": jax.random.uniform(k4, (c,), jnp.float32, -scale, scale),
    }


def reference_forward(x_bhwc, params, num_heads):
    """Pure-JAX f32 reference for correctness checking."""
    b, h, w, c = x_bhwc.shape
    n = h * w
    d = c // num_heads
    x = x_bhwc.reshape(b, n, c)
    qkv = x @ params["qkv_w"] + params["qkv_b"]
    qkv = qkv.reshape(b, n, 3, num_heads, d)
    qkv = jnp.transpose(qkv, (2, 0, 3, 1, 4))
    q, k, v = qkv[0], qkv[1], qkv[2]
    s = jnp.einsum("bhqd,bhkd->bhqk", q, k) / jnp.sqrt(jnp.float32(d))
    p = jax.nn.softmax(s, axis=-1)
    o = jnp.einsum("bhqk,bhkd->bhqd", p, v)
    o = jnp.transpose(o, (0, 2, 1, 3)).reshape(b, n, c)
    o = o @ params["proj_w"] + params["proj_b"]
    return o.reshape(b, h, w, c)


if __name__ == "__main__":
    # Small shapes consistent with the module: B=2, H=W=8, C=32, 4 heads.
    B, H, W, C = 2, 8, 8, 32
    NUM_HEADS = 4

    key = jax.random.PRNGKey(0)
    k_x, k_p = jax.random.split(key)
    x = jax.random.normal(k_x, (B, H, W, C), dtype=jnp.float32)
    params = init_params(k_p, C)

    out = self_attention_forward(x, params, NUM_HEADS)
    out = jax.block_until_ready(out)

    ref = reference_forward(x, params, NUM_HEADS)
    assert out.shape == (B, H, W, C)
    # Tolerance sized for bf16 MXU operands (relative quantization ~4e-3 per
    # operand) plus the approx (EUP) softmax reciprocal; accumulation and all
    # softmax statistics are f32, so observed error is a few 1e-3 absolute.
    assert jnp.allclose(out, ref, atol=2e-2, rtol=2e-2), "mismatch vs reference"

    print("KERNEL_OK")
</pallas_src>

<mosaic_0001>
module attributes {stable_mosaic.version = 11 : i64} {
  func.func @_fused_self_attention_kernel(%arg0: i32, %arg1: memref<1x64x32xbf16, #tpu.memory_space<vmem>>, %arg2: memref<12x32x8xbf16, #tpu.memory_space<vmem>>, %arg3: memref<12x1x8xf32, #tpu.memory_space<vmem>>, %arg4: memref<4x8x32xbf16, #tpu.memory_space<vmem>>, %arg5: memref<1x32xf32, #tpu.memory_space<vmem>>, %arg6: memref<1x64x32xf32, #tpu.memory_space<vmem>>) attributes {dimension_semantics = [#tpu.dimension_semantics<parallel>], iteration_bounds = array<i64: 2>, scalar_prefetch = 0 : i64, scratch_operands = 0 : i64, tpu.core_type = #tpu.core_type<tc>, window_params = [{transform_indices = @transform_0, window_bounds = array<i64: 1, 64, 32>}, {pipeline_mode = #tpu.pipeline_mode<synchronous>, transform_indices = @transform_1, window_bounds = array<i64: 12, 32, 8>}, {pipeline_mode = #tpu.pipeline_mode<synchronous>, transform_indices = @transform_2, window_bounds = array<i64: 12, 1, 8>}, {pipeline_mode = #tpu.pipeline_mode<synchronous>, transform_indices = @transform_3, window_bounds = array<i64: 4, 8, 32>}, {pipeline_mode = #tpu.pipeline_mode<synchronous>, transform_indices = @transform_4, window_bounds = array<i64: 1, 32>}, {transform_indices = @transform_5, window_bounds = array<i64: 1, 64, 32>}]} {
    %c0 = arith.constant 0 : index
    %c0_0 = arith.constant 0 : index
    %c0_1 = arith.constant 0 : index
    %0 = vector.load %arg1[%c0, %c0_0, %c0_1] : memref<1x64x32xbf16, #tpu.memory_space<vmem>>, vector<1x64x32xbf16>
    %1 = vector.shape_cast %0 : vector<1x64x32xbf16> to vector<64x32xbf16>
    %cst = arith.constant 0.000000e+00 : f32
    %2 = vector.broadcast %cst : f32 to vector<64x32xf32>
    %c0_2 = arith.constant 0 : index
    %c0_3 = arith.constant 0 : index
    %c0_4 = arith.constant 0 : index
    %3 = vector.load %arg2[%c0_2, %c0_3, %c0_4] : memref<12x32x8xbf16, #tpu.memory_space<vmem>>, vector<1x32x8xbf16>
    %4 = vector.shape_cast %3 : vector<1x32x8xbf16> to vector<32x8xbf16>
    %cst_5 = arith.constant dense<0.000000e+00> : vector<64x8xf32>
    %5 = tpu.matmul %1, %4, %cst_5 {dimension_numbers = #tpu.dot_dimension_numbers<[1], [0], [0], [1], [0, 0, 1, 1], [], []>} : vector<64x32xbf16>, vector<32x8xbf16>, vector<64x8xf32> -> vector<64x8xf32>
    %c0_6 = arith.constant 0 : index
    %c0_7 = arith.constant 0 : index
    %c0_8 = arith.constant 0 : index
    %6 = vector.load %arg3[%c0_6, %c0_7, %c0_8] : memref<12x1x8xf32, #tpu.memory_space<vmem>>, vector<1x1x8xf32>
    %7 = vector.shape_cast %6 : vector<1x1x8xf32> to vector<1x8xf32>
    %8 = vector.broadcast %7 : vector<1x8xf32> to vector<64x8xf32>
    %9 = arith.addf %5, %8 : vector<64x8xf32>
    %c4 = arith.constant 4 : index
    %c0_9 = arith.constant 0 : index
    %c0_10 = arith.constant 0 : index
    %10 = vector.load %arg2[%c4, %c0_9, %c0_10] : memref<12x32x8xbf16, #tpu.memory_space<vmem>>, vector<1x32x8xbf16>
    %11 = vector.shape_cast %10 : vector<1x32x8xbf16> to vector<32x8xbf16>
    %cst_11 = arith.constant dense<0.000000e+00> : vector<64x8xf32>
    %12 = tpu.matmul %1, %11, %cst_11 {dimension_numbers = #tpu.dot_dimension_numbers<[1], [0], [0], [1], [0, 0, 1, 1], [], []>} : vector<64x32xbf16>, vector<32x8xbf16>, vector<64x8xf32> -> vector<64x8xf32>
    %c4_12 = arith.constant 4 : index
    %c0_13 = arith.constant 0 : index
    %c0_14 = arith.constant 0 : index
    %13 = vector.load %arg3[%c4_12, %c0_13, %c0_14] : memref<12x1x8xf32, #tpu.memory_space<vmem>>, vector<1x1x8xf32>
    %14 = vector.shape_cast %13 : vector<1x1x8xf32> to vector<1x8xf32>
    %15 = vector.broadcast %14 : vector<1x8xf32> to vector<64x8xf32>
    %16 = arith.addf %12, %15 : vector<64x8xf32>
    %c8 = arith.constant 8 : index
    %c0_15 = arith.constant 0 : index
    %c0_16 = arith.constant 0 : index
    %17 = vector.load %arg2[%c8, %c0_15, %c0_16] : memref<12x32x8xbf16, #tpu.memory_space<vmem>>, vector<1x32x8xbf16>
    %18 = vector.shape_cast %17 : vector<1x32x8xbf16> to vector<32x8xbf16>
    %cst_17 = arith.constant dense<0.000000e+00> : vector<64x8xf32>
    %19 = tpu.matmul %1, %18, %cst_17 {dimension_numbers = #tpu.dot_dimension_numbers<[1], [0], [0], [1], [0, 0, 1, 1], [], []>} : vector<64x32xbf16>, vector<32x8xbf16>, vector<64x8xf32> -> vector<64x8xf32>
    %c8_18 = arith.constant 8 : index
    %c0_19 = arith.constant 0 : index
    %c0_20 = arith.constant 0 : index
    %20 = vector.load %arg3[%c8_18, %c0_19, %c0_20] : memref<12x1x8xf32, #tpu.memory_space<vmem>>, vector<1x1x8xf32>
    %21 = vector.shape_cast %20 : vector<1x1x8xf32> to vector<1x8xf32>
    %22 = vector.broadcast %21 : vector<1x8xf32> to vector<64x8xf32>
    %23 = arith.addf %19, %22 : vector<64x8xf32>
    %24 = arith.truncf %9 : vector<64x8xf32> to vector<64x8xbf16>
    %25 = arith.truncf %16 : vector<64x8xf32> to vector<64x8xbf16>
    %cst_21 = arith.constant dense<0.000000e+00> : vector<64x64xf32>
    %26 = tpu.matmul %24, %25, %cst_21 {dimension_numbers = #tpu.dot_dimension_numbers<[1], [1], [0], [0], [0, 0, 1, 0], [], []>} : vector<64x8xbf16>, vector<64x8xbf16>, vector<64x64xf32> -> vector<64x64xf32>
    %cst_22 = arith.constant dense<0xFF800000> : vector<64xf32>
    %27 = vector.multi_reduction <maximumf>, %26, %cst_22 [1] : vector<64x64xf32> to vector<64xf32>
    %28 = vector.shape_cast %27 : vector<64xf32> to vector<64x1xf32>
    %29 = vector.broadcast %28 : vector<64x1xf32> to vector<64x64xf32>
    %30 = arith.subf %26, %29 : vector<64x64xf32>
    %31 = math.exp %30 : vector<64x64xf32>
    %cst_23 = arith.constant dense<0.000000e+00> : vector<64xf32>
    %32 = vector.multi_reduction <add>, %31, %cst_23 [1] : vector<64x64xf32> to vector<64xf32>
    %33 = vector.shape_cast %32 : vector<64xf32> to vector<64x1xf32>
    %34 = arith.truncf %31 : vector<64x64xf32> to vector<64x64xbf16>
    %35 = arith.truncf %23 : vector<64x8xf32> to vector<64x8xbf16>
    %cst_24 = arith.constant dense<0.000000e+00> : vector<64x8xf32>
    %36 = tpu.matmul %34, %35, %cst_24 {dimension_numbers = #tpu.dot_dimension_numbers<[1], [0], [0], [1], [0, 0, 1, 1], [], []>} : vector<64x64xbf16>, vector<64x8xbf16>, vector<64x8xf32> -> vector<64x8xf32>
    %37 = tpu.reciprocal %33 {approx = true} : vector<64x1xf32> -> vector<64x1xf32>
    %38 = vector.broadcast %37 : vector<64x1xf32> to vector<64x8xf32>
    %39 = arith.mulf %36, %38 : vector<64x8xf32>
    %40 = arith.truncf %39 : vector<64x8xf32> to vector<64x8xbf16>
    %c0_25 = arith.constant 0 : index
    %c0_26 = arith.constant 0 : index
    %c0_27 = arith.constant 0 : index
    %41 = vector.load %arg4[%c0_25, %c0_26, %c0_27] : memref<4x8x32xbf16, #tpu.memory_space<vmem>>, vector<1x8x32xbf16>
    %42 = vector.shape_cast %41 : vector<1x8x32xbf16> to vector<8x32xbf16>
    %cst_28 = arith.constant dense<0.000000e+00> : vector<64x32xf32>
    %43 = tpu.matmul %40, %42, %cst_28 {dimension_numbers = #tpu.dot_dimension_numbers<[1], [0], [0], [1], [0, 0, 1, 1], [], []>} : vector<64x8xbf16>, vector<8x32xbf16>, vector<64x32xf32> -> vector<64x32xf32>
    %44 = arith.addf %2, %43 : vector<64x32xf32>
    %c1 = arith.constant 1 : index
    %c0_29 = arith.constant 0 : index
    %c0_30 = arith.constant 0 : index
    %45 = vector.load %arg2[%c1, %c0_29, %c0_30] : memref<12x32x8xbf16, #tpu.memory_space<vmem>>, vector<1x32x8xbf16>
    %46 = vector.shape_cast %45 : vector<1x32x8xbf16> to vector<32x8xbf16>
    %cst_31 = arith.constant dense<0.000000e+00> : vector<64x8xf32>
    %47 = tpu.matmul %1, %46, %cst_31 {dimension_numbers = #tpu.dot_dimension_numbers<[1], [0], [0], [1], [0, 0, 1, 1], [], []>} : vector<64x32xbf16>, vector<32x8xbf16>, vector<64x8xf32> -> vector<64x8xf32>
    %c1_32 = arith.constant 1 : index
    %c0_33 = arith.constant 0 : index
    %c0_34 = arith.constant 0 : index
    %48 = vector.load %arg3[%c1_32, %c0_33, %c0_34] : memref<12x1x8xf32, #tpu.memory_space<vmem>>, vector<1x1x8xf32>
    %49 = vector.shape_cast %48 : vector<1x1x8xf32> to vector<1x8xf32>
    %50 = vector.broadcast %49 : vector<1x8xf32> to vector<64x8xf32>
    %51 = arith.addf %47, %50 : vector<64x8xf32>
    %c5 = arith.constant 5 : index
    %c0_35 = arith.constant 0 : index
    %c0_36 = arith.constant 0 : index
    %52 = vector.load %arg2[%c5, %c0_35, %c0_36] : memref<12x32x8xbf16, #tpu.memory_space<vmem>>, vector<1x32x8xbf16>
    %53 = vector.shape_cast %52 : vector<1x32x8xbf16> to vector<32x8xbf16>
    %cst_37 = arith.constant dense<0.000000e+00> : vector<64x8xf32>
    %54 = tpu.matmul %1, %53, %cst_37 {dimension_numbers = #tpu.dot_dimension_numbers<[1], [0], [0], [1], [0, 0, 1, 1], [], []>} : vector<64x32xbf16>, vector<32x8xbf16>, vector<64x8xf32> -> vector<64x8xf32>
    %c5_38 = arith.constant 5 : index
    %c0_39 = arith.constant 0 : index
    %c0_40 = arith.constant 0 : index
    %55 = vector.load %arg3[%c5_38, %c0_39, %c0_40] : memref<12x1x8xf32, #tpu.memory_space<vmem>>, vector<1x1x8xf32>
    %56 = vector.shape_cast %55 : vector<1x1x8xf32> to vector<1x8xf32>
    %57 = vector.broadcast %56 : vector<1x8xf32> to vector<64x8xf32>
    %58 = arith.addf %54, %57 : vector<64x8xf32>
    %c9 = arith.constant 9 : index
    %c0_41 = arith.constant 0 : index
    %c0_42 = arith.constant 0 : index
    %59 = vector.load %arg2[%c9, %c0_41, %c0_42] : memref<12x32x8xbf16, #tpu.memory_space<vmem>>, vector<1x32x8xbf16>
    %60 = vector.shape_cast %59 : vector<1x32x8xbf16> to vector<32x8xbf16>
    %cst_43 = arith.constant dense<0.000000e+00> : vector<64x8xf32>
    %61 = tpu.matmul %1, %60, %cst_43 {dimension_numbers = #tpu.dot_dimension_numbers<[1], [0], [0], [1], [0, 0, 1, 1], [], []>} : vector<64x32xbf16>, vector<32x8xbf16>, vector<64x8xf32> -> vector<64x8xf32>
    %c9_44 = arith.constant 9 : index
    %c0_45 = arith.constant 0 : index
    %c0_46 = arith.constant 0 : index
    %62 = vector.load %arg3[%c9_44, %c0_45, %c0_46] : memref<12x1x8xf32, #tpu.memory_space<vmem>>, vector<1x1x8xf32>
    %63 = vector.shape_cast %62 : vector<1x1x8xf32> to vector<1x8xf32>
    %64 = vector.broadcast %63 : vector<1x8xf32> to vector<64x8xf32>
    %65 = arith.addf %61, %64 : vector<64x8xf32>
    %66 = arith.truncf %51 : vector<64x8xf32> to vector<64x8xbf16>
    %67 = arith.truncf %58 : vector<64x8xf32> to vector<64x8xbf16>
    %cst_47 = arith.constant dense<0.000000e+00> : vector<64x64xf32>
    %68 = tpu.matmul %66, %67, %cst_47 {dimension_numbers = #tpu.dot_dimension_numbers<[1], [1], [0], [0], [0, 0, 1, 0], [], []>} : vector<64x8xbf16>, vector<64x8xbf16>, vector<64x64xf32> -> vector<64x64xf32>
    %cst_48 = arith.constant dense<0xFF800000> : vector<64xf32>
    %69 = vector.multi_reduction <maximumf>, %68, %cst_48 [1] : vector<64x64xf32> to vector<64xf32>
    %70 = vector.shape_cast %69 : vector<64xf32> to vector<64x1xf32>
    %71 = vector.broadcast %70 : vector<64x1xf32> to vector<64x64xf32>
    %72 = arith.subf %68, %71 : vector<64x64xf32>
    %73 = math.exp %72 : vector<64x64xf32>
    %cst_49 = arith.constant dense<0.000000e+00> : vector<64xf32>
    %74 = vector.multi_reduction <add>, %73, %cst_49 [1] : vector<64x64xf32> to vector<64xf32>
    %75 = vector.shape_cast %74 : vector<64xf32> to vector<64x1xf32>
    %76 = arith.truncf %73 : vector<64x64xf32> to vector<64x64xbf16>
    %77 = arith.truncf %65 : vector<64x8xf32> to vector<64x8xbf16>
    %cst_50 = arith.constant dense<0.000000e+00> : vector<64x8xf32>
    %78 = tpu.matmul %76, %77, %cst_50 {dimension_numbers = #tpu.dot_dimension_numbers<[1], [0], [0], [1], [0, 0, 1, 1], [], []>} : vector<64x64xbf16>, vector<64x8xbf16>, vector<64x8xf32> -> vector<64x8xf32>
    %79 = tpu.reciprocal %75 {approx = true} : vector<64x1xf32> -> vector<64x1xf32>
    %80 = vector.broadcast %79 : vector<64x1xf32> to vector<64x8xf32>
    %81 = arith.mulf %78, %80 : vector<64x8xf32>
    %82 = arith.truncf %81 : vector<64x8xf32> to vector<64x8xbf16>
    %c1_51 = arith.constant 1 : index
    %c0_52 = arith.constant 0 : index
    %c0_53 = arith.constant 0 : index
    %83 = vector.load %arg4[%c1_51, %c0_52, %c0_53] : memref<4x8x32xbf16, #tpu.memory_space<vmem>>, vector<1x8x32xbf16>
    %84 = vector.shape_cast %83 : vector<1x8x32xbf16> to vector<8x32xbf16>
    %cst_54 = arith.constant dense<0.000000e+00> : vector<64x32xf32>
    %85 = tpu.matmul %82, %84, %cst_54 {dimension_numbers = #tpu.dot_dimension_numbers<[1], [0], [0], [1], [0, 0, 1, 1], [], []>} : vector<64x8xbf16>, vector<8x32xbf16>, vector<64x32xf32> -> vector<64x32xf32>
    %86 = arith.addf %44, %85 : vector<64x32xf32>
    %c2 = arith.constant 2 : index
    %c0_55 = arith.constant 0 : index
    %c0_56 = arith.constant 0 : index
    %87 = vector.load %arg2[%c2, %c0_55, %c0_56] : memref<12x32x8xbf16, #tpu.memory_space<vmem>>, vector<1x32x8xbf16>
    %88 = vector.shape_cast %87 : vector<1x32x8xbf16> to vector<32x8xbf16>
    %cst_57 = arith.constant dense<0.000000e+00> : vector<64x8xf32>
    %89 = tpu.matmul %1, %88, %cst_57 {dimension_numbers = #tpu.dot_dimension_numbers<[1], [0], [0], [1], [0, 0, 1, 1], [], []>} : vector<64x32xbf16>, vector<32x8xbf16>, vector<64x8xf32> -> vector<64x8xf32>
    %c2_58 = arith.constant 2 : index
    %c0_59 = arith.constant 0 : index
    %c0_60 = arith.constant 0 : index
    %90 = vector.load %arg3[%c2_58, %c0_59, %c0_60] : memref<12x1x8xf32, #tpu.memory_space<vmem>>, vector<1x1x8xf32>
    %91 = vector.shape_cast %90 : vector<1x1x8xf32> to vector<1x8xf32>
    %92 = vector.broadcast %91 : vector<1x8xf32> to vector<64x8xf32>
    %93 = arith.addf %89, %92 : vector<64x8xf32>
    %c6 = arith.constant 6 : index
    %c0_61 = arith.constant 0 : index
    %c0_62 = arith.constant 0 : index
    %94 = vector.load %arg2[%c6, %c0_61, %c0_62] : memref<12x32x8xbf16, #tpu.memory_space<vmem>>, vector<1x32x8xbf16>
    %95 = vector.shape_cast %94 : vector<1x32x8xbf16> to vector<32x8xbf16>
    %cst_63 = arith.constant dense<0.000000e+00> : vector<64x8xf32>
    %96 = tpu.matmul %1, %95, %cst_63 {dimension_numbers = #tpu.dot_dimension_numbers<[1], [0], [0], [1], [0, 0, 1, 1], [], []>} : vector<64x32xbf16>, vector<32x8xbf16>, vector<64x8xf32> -> vector<64x8xf32>
    %c6_64 = arith.constant 6 : index
    %c0_65 = arith.constant 0 : index
    %c0_66 = arith.constant 0 : index
    %97 = vector.load %arg3[%c6_64, %c0_65, %c0_66] : memref<12x1x8xf32, #tpu.memory_space<vmem>>, vector<1x1x8xf32>
    %98 = vector.shape_cast %97 : vector<1x1x8xf32> to vector<1x8xf32>
    %99 = vector.broadcast %98 : vector<1x8xf32> to vector<64x8xf32>
    %100 = arith.addf %96, %99 : vector<64x8xf32>
    %c10 = arith.constant 10 : index
    %c0_67 = arith.constant 0 : index
    %c0_68 = arith.constant 0 : index
    %101 = vector.load %arg2[%c10, %c0_67, %c0_68] : memref<12x32x8xbf16, #tpu.memory_space<vmem>>, vector<1x32x8xbf16>
    %102 = vector.shape_cast %101 : vector<1x32x8xbf16> to vector<32x8xbf16>
    %cst_69 = arith.constant dense<0.000000e+00> : vector<64x8xf32>
    %103 = tpu.matmul %1, %102, %cst_69 {dimension_numbers = #tpu.dot_dimension_numbers<[1], [0], [0], [1], [0, 0, 1, 1], [], []>} : vector<64x32xbf16>, vector<32x8xbf16>, vector<64x8xf32> -> vector<64x8xf32>
    %c10_70 = arith.constant 10 : index
    %c0_71 = arith.constant 0 : index
    %c0_72 = arith.constant 0 : index
    %104 = vector.load %arg3[%c10_70, %c0_71, %c0_72] : memref<12x1x8xf32, #tpu.memory_space<vmem>>, vector<1x1x8xf32>
    %105 = vector.shape_cast %104 : vector<1x1x8xf32> to vector<1x8xf32>
    %106 = vector.broadcast %105 : vector<1x8xf32> to vector<64x8xf32>
    %107 = arith.addf %103, %106 : vector<64x8xf32>
    %108 = arith.truncf %93 : vector<64x8xf32> to vector<64x8xbf16>
    %109 = arith.truncf %100 : vector<64x8xf32> to vector<64x8xbf16>
    %cst_73 = arith.constant dense<0.000000e+00> : vector<64x64xf32>
    %110 = tpu.matmul %108, %109, %cst_73 {dimension_numbers = #tpu.dot_dimension_numbers<[1], [1], [0], [0], [0, 0, 1, 0], [], []>} : vector<64x8xbf16>, vector<64x8xbf16>, vector<64x64xf32> -> vector<64x64xf32>
    %cst_74 = arith.constant dense<0xFF800000> : vector<64xf32>
    %111 = vector.multi_reduction <maximumf>, %110, %cst_74 [1] : vector<64x64xf32> to vector<64xf32>
    %112 = vector.shape_cast %111 : vector<64xf32> to vector<64x1xf32>
    %113 = vector.broadcast %112 : vector<64x1xf32> to vector<64x64xf32>
    %114 = arith.subf %110, %113 : vector<64x64xf32>
    %115 = math.exp %114 : vector<64x64xf32>
    %cst_75 = arith.constant dense<0.000000e+00> : vector<64xf32>
    %116 = vector.multi_reduction <add>, %115, %cst_75 [1] : vector<64x64xf32> to vector<64xf32>
    %117 = vector.shape_cast %116 : vector<64xf32> to vector<64x1xf32>
    %118 = arith.truncf %115 : vector<64x64xf32> to vector<64x64xbf16>
    %119 = arith.truncf %107 : vector<64x8xf32> to vector<64x8xbf16>
    %cst_76 = arith.constant dense<0.000000e+00> : vector<64x8xf32>
    %120 = tpu.matmul %118, %119, %cst_76 {dimension_numbers = #tpu.dot_dimension_numbers<[1], [0], [0], [1], [0, 0, 1, 1], [], []>} : vector<64x64xbf16>, vector<64x8xbf16>, vector<64x8xf32> -> vector<64x8xf32>
    %121 = tpu.reciprocal %117 {approx = true} : vector<64x1xf32> -> vector<64x1xf32>
    %122 = vector.broadcast %121 : vector<64x1xf32> to vector<64x8xf32>
    %123 = arith.mulf %120, %122 : vector<64x8xf32>
    %124 = arith.truncf %123 : vector<64x8xf32> to vector<64x8xbf16>
    %c2_77 = arith.constant 2 : index
    %c0_78 = arith.constant 0 : index
    %c0_79 = arith.constant 0 : index
    %125 = vector.load %arg4[%c2_77, %c0_78, %c0_79] : memref<4x8x32xbf16, #tpu.memory_space<vmem>>, vector<1x8x32xbf16>
    %126 = vector.shape_cast %125 : vector<1x8x32xbf16> to vector<8x32xbf16>
    %cst_80 = arith.constant dense<0.000000e+00> : vector<64x32xf32>
    %127 = tpu.matmul %124, %126, %cst_80 {dimension_numbers = #tpu.dot_dimension_numbers<[1], [0], [0], [1], [0, 0, 1, 1], [], []>} : vector<64x8xbf16>, vector<8x32xbf16>, vector<64x32xf32> -> vector<64x32xf32>
    %128 = arith.addf %86, %127 : vector<64x32xf32>
    %c3 = arith.constant 3 : index
    %c0_81 = arith.constant 0 : index
    %c0_82 = arith.constant 0 : index
    %129 = vector.load %arg2[%c3, %c0_81, %c0_82] : memref<12x32x8xbf16, #tpu.memory_space<vmem>>, vector<1x32x8xbf16>
    %130 = vector.shape_cast %129 : vector<1x32x8xbf16> to vector<32x8xbf16>
    %cst_83 = arith.constant dense<0.000000e+00> : vector<64x8xf32>
    %131 = tpu.matmul %1, %130, %cst_83 {dimension_numbers = #tpu.dot_dimension_numbers<[1], [0], [0], [1], [0, 0, 1, 1], [], []>} : vector<64x32xbf16>, vector<32x8xbf16>, vector<64x8xf32> -> vector<64x8xf32>
    %c3_84 = arith.constant 3 : index
    %c0_85 = arith.constant 0 : index
    %c0_86 = arith.constant 0 : index
    %132 = vector.load %arg3[%c3_84, %c0_85, %c0_86] : memref<12x1x8xf32, #tpu.memory_space<vmem>>, vector<1x1x8xf32>
    %133 = vector.shape_cast %132 : vector<1x1x8xf32> to vector<1x8xf32>
    %134 = vector.broadcast %133 : vector<1x8xf32> to vector<64x8xf32>
    %135 = arith.addf %131, %134 : vector<64x8xf32>
    %c7 = arith.constant 7 : index
    %c0_87 = arith.constant 0 : index
    %c0_88 = arith.constant 0 : index
    %136 = vector.load %arg2[%c7, %c0_87, %c0_88] : memref<12x32x8xbf16, #tpu.memory_space<vmem>>, vector<1x32x8xbf16>
    %137 = vector.shape_cast %136 : vector<1x32x8xbf16> to vector<32x8xbf16>
    %cst_89 = arith.constant dense<0.000000e+00> : vector<64x8xf32>
    %138 = tpu.matmul %1, %137, %cst_89 {dimension_numbers = #tpu.dot_dimension_numbers<[1], [0], [0], [1], [0, 0, 1, 1], [], []>} : vector<64x32xbf16>, vector<32x8xbf16>, vector<64x8xf32> -> vector<64x8xf32>
    %c7_90 = arith.constant 7 : index
    %c0_91 = arith.constant 0 : index
    %c0_92 = arith.constant 0 : index
    %139 = vector.load %arg3[%c7_90, %c0_91, %c0_92] : memref<12x1x8xf32, #tpu.memory_space<vmem>>, vector<1x1x8xf32>
    %140 = vector.shape_cast %139 : vector<1x1x8xf32> to vector<1x8xf32>
    %141 = vector.broadcast %140 : vector<1x8xf32> to vector<64x8xf32>
    %142 = arith.addf %138, %141 : vector<64x8xf32>
    %c11 = arith.constant 11 : index
    %c0_93 = arith.constant 0 : index
    %c0_94 = arith.constant 0 : index
    %143 = vector.load %arg2[%c11, %c0_93, %c0_94] : memref<12x32x8xbf16, #tpu.memory_space<vmem>>, vector<1x32x8xbf16>
    %144 = vector.shape_cast %143 : vector<1x32x8xbf16> to vector<32x8xbf16>
    %cst_95 = arith.constant dense<0.000000e+00> : vector<64x8xf32>
    %145 = tpu.matmul %1, %144, %cst_95 {dimension_numbers = #tpu.dot_dimension_numbers<[1], [0], [0], [1], [0, 0, 1, 1], [], []>} : vector<64x32xbf16>, vector<32x8xbf16>, vector<64x8xf32> -> vector<64x8xf32>
    %c11_96 = arith.constant 11 : index
    %c0_97 = arith.constant 0 : index
    %c0_98 = arith.constant 0 : index
    %146 = vector.load %arg3[%c11_96, %c0_97, %c0_98] : memref<12x1x8xf32, #tpu.memory_space<vmem>>, vector<1x1x8xf32>
    %147 = vector.shape_cast %146 : vector<1x1x8xf32> to vector<1x8xf32>
    %148 = vector.broadcast %147 : vector<1x8xf32> to vector<64x8xf32>
    %149 = arith.addf %145, %148 : vector<64x8xf32>
    %150 = arith.truncf %135 : vector<64x8xf32> to vector<64x8xbf16>
    %151 = arith.truncf %142 : vector<64x8xf32> to vector<64x8xbf16>
    %cst_99 = arith.constant dense<0.000000e+00> : vector<64x64xf32>
    %152 = tpu.matmul %150, %151, %cst_99 {dimension_numbers = #tpu.dot_dimension_numbers<[1], [1], [0], [0], [0, 0, 1, 0], [], []>} : vector<64x8xbf16>, vector<64x8xbf16>, vector<64x64xf32> -> vector<64x64xf32>
    %cst_100 = arith.constant dense<0xFF800000> : vector<64xf32>
    %153 = vector.multi_reduction <maximumf>, %152, %cst_100 [1] : vector<64x64xf32> to vector<64xf32>
    %154 = vector.shape_cast %153 : vector<64xf32> to vector<64x1xf32>
    %155 = vector.broadcast %154 : vector<64x1xf32> to vector<64x64xf32>
    %156 = arith.subf %152, %155 : vector<64x64xf32>
    %157 = math.exp %156 : vector<64x64xf32>
    %cst_101 = arith.constant dense<0.000000e+00> : vector<64xf32>
    %158 = vector.multi_reduction <add>, %157, %cst_101 [1] : vector<64x64xf32> to vector<64xf32>
    %159 = vector.shape_cast %158 : vector<64xf32> to vector<64x1xf32>
    %160 = arith.truncf %157 : vector<64x64xf32> to vector<64x64xbf16>
    %161 = arith.truncf %149 : vector<64x8xf32> to vector<64x8xbf16>
    %cst_102 = arith.constant dense<0.000000e+00> : vector<64x8xf32>
    %162 = tpu.matmul %160, %161, %cst_102 {dimension_numbers = #tpu.dot_dimension_numbers<[1], [0], [0], [1], [0, 0, 1, 1], [], []>} : vector<64x64xbf16>, vector<64x8xbf16>, vector<64x8xf32> -> vector<64x8xf32>
    %163 = tpu.reciprocal %159 {approx = true} : vector<64x1xf32> -> vector<64x1xf32>
    %164 = vector.broadcast %163 : vector<64x1xf32> to vector<64x8xf32>
    %165 = arith.mulf %162, %164 : vector<64x8xf32>
    %166 = arith.truncf %165 : vector<64x8xf32> to vector<64x8xbf16>
    %c3_103 = arith.constant 3 : index
    %c0_104 = arith.constant 0 : index
    %c0_105 = arith.constant 0 : index
    %167 = vector.load %arg4[%c3_103, %c0_104, %c0_105] : memref<4x8x32xbf16, #tpu.memory_space<vmem>>, vector<1x8x32xbf16>
    %168 = vector.shape_cast %167 : vector<1x8x32xbf16> to vector<8x32xbf16>
    %cst_106 = arith.constant dense<0.000000e+00> : vector<64x32xf32>
    %169 = tpu.matmul %166, %168, %cst_106 {dimension_numbers = #tpu.dot_dimension_numbers<[1], [0], [0], [1], [0, 0, 1, 1], [], []>} : vector<64x8xbf16>, vector<8x32xbf16>, vector<64x32xf32> -> vector<64x32xf32>
    %170 = arith.addf %128, %169 : vector<64x32xf32>
    %c0_107 = arith.constant 0 : index
    %c0_108 = arith.constant 0 : index
    %171 = vector.load %arg5[%c0_107, %c0_108] : memref<1x32xf32, #tpu.memory_space<vmem>>, vector<1x32xf32>
    %172 = vector.broadcast %171 : vector<1x32xf32> to vector<64x32xf32>
    %173 = arith.addf %170, %172 : vector<64x32xf32>
    %c0_109 = arith.constant 0 : index
    %c0_110 = arith.constant 0 : index
    %c0_111 = arith.constant 0 : index
    %174 = vector.load %arg6[%c0_109, %c0_110, %c0_111] : memref<1x64x32xf32, #tpu.memory_space<vmem>>, vector<1x64x32xf32>
    %175 = vector.shape_cast %174 : vector<1x64x32xf32> to vector<64x32xf32>
    %176 = vector.shape_cast %173 : vector<64x32xf32> to vector<1x64x32xf32>
    tpu.vector_store %arg6[%c0_109, %c0_110, %c0_111], %176 {strides = array<i32>} : memref<1x64x32xf32, #tpu.memory_space<vmem>>, vector<1x64x32xf32>,
    return
  }
  func.func @transform_0(%arg0: i32) -> (i32, i32, i32) {
    %c0_i32 = arith.constant 0 : i32
    %c0_i32_0 = arith.constant 0 : i32
    %c0_i32_1 = arith.constant 0 : i32
    return %arg0, %c0_i32, %c0_i32_0 : i32, i32, i32
  }
  func.func @transform_1(%arg0: i32) -> (i32, i32, i32) {
    %c0_i32 = arith.constant 0 : i32
    %c0_i32_0 = arith.constant 0 : i32
    %c0_i32_1 = arith.constant 0 : i32
    %c0_i32_2 = arith.constant 0 : i32
    return %c0_i32, %c0_i32_0, %c0_i32_1 : i32, i32, i32
  }
  func.func @transform_2(%arg0: i32) -> (i32, i32, i32) {
    %c0_i32 = arith.constant 0 : i32
    %c0_i32_0 = arith.constant 0 : i32
    %c0_i32_1 = arith.constant 0 : i32
    %c0_i32_2 = arith.constant 0 : i32
    return %c0_i32, %c0_i32_0, %c0_i32_1 : i32, i32, i32
  }
  func.func @transform_3(%arg0: i32) -> (i32, i32, i32) {
    %c0_i32 = arith.constant 0 : i32
    %c0_i32_0 = arith.constant 0 : i32
    %c0_i32_1 = arith.constant 0 : i32
    %c0_i32_2 = arith.constant 0 : i32
    return %c0_i32, %c0_i32_0, %c0_i32_1 : i32, i32, i32
  }
  func.func @transform_4(%arg0: i32) -> (i32, i32) {
    %c0_i32 = arith.constant 0 : i32
    %c0_i32_0 = arith.constant 0 : i32
    %c0_i32_1 = arith.constant 0 : i32
    return %c0_i32, %c0_i32_0 : i32, i32
  }
  func.func @transform_5(%arg0: i32) -> (i32, i32, i32) {
    %c0_i32 = arith.constant 0 : i32
    %c0_i32_0 = arith.constant 0 : i32
    %c0_i32_1 = arith.constant 0 : i32
    return %arg0, %c0_i32, %c0_i32_0 : i32, i32, i32
  }
}

</mosaic_0001>

<bundles_post_ra>
// kernel: tpu_custom_call.1
= control target key start
LH: loop header
LB: loop body
LE: loop exit
PB: predicated region body
PF: predicated region fallthrough
CT: control target
= control target key end

     0   :  { %s3791_s18 = smov 0   ;;  %s4393_s0 = inlined_call_operand.vmem [shape: bf16[2,64,32], index: 0, kind: input, shape index: {}]   ;;  %s4394_s1 = inlined_call_operand.vmem [shape: bf16[12,32,8], index: 1, kind: input, shape index: {}]   ;;  %s4395_s2 = inlined_call_operand.vmem [shape: f32[12,1,8], index: 2, kind: input, shape index: {}]   ;;  %s4396_s3 = inlined_call_operand.vmem [shape: bf16[4,8,32], index: 3, kind: input, shape index: {}]   ;;  %s4397_s4 = inlined_call_operand.vmem [shape: f32[1,32], index: 4, kind: input, shape index: {}]   ;;  %s4398_s5 = inlined_call_operand.vmem [shape: f32[2,64,32], index: 5, kind: output, shape index: {}]  }
   0x1 LB: > { %s2865_s19 = sadd.s32 4294967295, %s3759_s18   ;;  %p2869_p0 = scmp.ge.s32.totalorder %s3759_s18, 1  ;;  %s3759_s18 = sphi %s3791_s18, %s15_s18  }
   0x2   : > { %p187_p1 = scmp.lt.s32.totalorder %s3759_s18, 3 }
   0x4   : > { %p188_p2 = pnand %p2869_p0, %p187_p1 }
   0x5   : > { %v3593_v0 = vld [vmem:[%s4394_s1] sm:$0xff] (!%p188_p2)   ;;  %p215_p3 = scmp.lt.s32.totalorder (!%p188_p2), %s2865_s19, 1  ;;  %v3594_v1 = vld [vmem:[%s4394_s1 + $0x8] sm:$0xff] (!%p188_p2)   ;;  %vm277_vm0 = vcmask (!%p188_p2), 261120   ;;  %vm543_vm1 = vcmask (!%p188_p2), 64512   ;;  %v3603_v56 = vld [vmem:[%s4394_s1 + $0x50] sm:$0xff] (!%p188_p2)  }
   0x6   : > { %191 = sbr.rel (%p188_p2) target bundleno = 3078 (0xc06), region = 40  ;;  %3229 = vmatprep.subr.bf16.mxu1 (!%p188_p2), %v3593_v0  ;;  %v3597_v2 = vld [vmem:[%s4394_s1 + $0x40] sm:$0xff] (!%p188_p2)   ;;  %v3600_v4 = vld [vmem:[%s4394_s1 + $0x48] sm:$0xff] (!%p188_p2)   ;;  %v3604_v58 = vld [vmem:[%s4394_s1 + $0x58] sm:$0xff] (!%p188_p2)   ;;  %vm633_vm2 = vcmask (!%p188_p2), 523264   ;;  %vm1370_vm3 = vcmask (!%p188_p2), 1043456  }
   0x7   : > { %3230 = vmatpush3.bf16.msra.mxu1 (!%p188_p2), %v3593_v0  ;;  %v3601_v8 = vld [vmem:[%s4394_s1 + $0x80] sm:$0xff] (!%p188_p2)   ;;  %v3602_v9 = vld [vmem:[%s4394_s1 + $0x88] sm:$0xff] (!%p188_p2)  }
   0x8   : > { %3231 = vmatprep.subr.bf16.mxu1 (!%p188_p2), %v3594_v1  ;;  %3253 = vmatprep.subr.bf16.mxu0 (!%p188_p2), %v3601_v8  ;;  %v2874_v11 = vld [vmem:[%s4395_s2] ss:$0 sm:$0xff] (!%p188_p2)  ;;  %v2890_v32 = vld [vmem:[%s4395_s2 + $0x4] ss:$0 sm:$0xff] (!%p188_p2)  ;;  %v2902_v57 = vld [vmem:[%s4395_s2 + $0x8] ss:$0 sm:$0xff] (!%p188_p2) }
   0x9   : > { %3254 = vmatpush3.bf16.msra.mxu0 (!%p188_p2), %v3601_v8 }
   0xa   : > { %3255 = vmatprep.subr.bf16.mxu0 (!%p188_p2), %v3602_v9 }
   0xb   : > { %3232 = vmatpush3.bf16.msra.mxu1 (!%p188_p2), %v3594_v1 }
   0xc   : > { %3241 = vmatprep.subr.bf16.mxu1 (!%p188_p2), %v3597_v2 }
   0xd   : > { %s4400_s19 = smov (!%p215_p3, %s2865_s19), 1  ;;  %3256 = vmatpush3.bf16.msra.mxu0 %v3602_v9 }
   0xe   : > { %s3071_s24 = sshll.u32 %s4400_s19, 5  ;;  %s3072_s11 = sshll.u32 %s4400_s19, 6 }
   0xf   : > { %s3814_s29 = scalar_lea.vmem %s4393_s0, %s3071_s24  ;;  %s224_s16 = scalar_lea.vmem %s4398_s5, %s3072_s11 }
  0x10   : > { %v3817_v3 = vld [vmem:[%s3814_s29] sm:$0xff]   ;;  %v3823_v5 = vld [vmem:[%s3814_s29 + $0x8] sm:$0xff]   ;;  %v3828_v6 = vld [vmem:[%s3814_s29 + $0x10] sm:$0xff]  }
  0x11   : > { %3233 = vmatprep.mubr.msk.bf16.mxu1 %vm277_vm0, %v3817_v3  ;;  %3257 = vmatprep.mubr.msk.bf16.mxu0 %vm277_vm0, %v3817_v3  ;;  %v3837_v7 = vld [vmem:[%s3814_s29 + $0x18] sm:$0xff]  }
  0x12   : > { %3234 = vmatmul.mubr.msk.bf16.vlgmr.msra.gmra.mrb[0].mxu1 %vm277_vm0, %v3823_v5  ;;  %3258 = vmatmul.mubr.msk.bf16.vlgmr.msra.gmra.mrb[0].mxu0 %vm277_vm0, %v3823_v5 }
  0x13   : > { %3242 = vmatpush3.bf16.msra.mxu1 %v3597_v2  ;;  %3237 = vmatprep.mubr.msk.bf16.mxu1 %vm277_vm0, %v3828_v6 }
  0x14   : > { %3243 = vmatprep.subr.bf16.mxu1 %v3600_v4  ;;  %3261 = vmatprep.mubr.msk.bf16.mxu0 %vm277_vm0, %v3828_v6 }
  0x17   : > { %3244 = vmatpush3.bf16.msra.mxu1 %v3600_v4 }
  0x1a   : > { %3238 = vmatmul.mubr.msk.bf16.gmra.mrb[4].mxu1 %vm277_vm0, %v3837_v7  ;;  %3262 = vmatmul.mubr.msk.bf16.gmra.mrb[4].mxu0 %vm277_vm0, %v3837_v7 }
  0x1b   : > { %3245 = vmatprep.mubr.msk.bf16.mxu1 %vm277_vm0, %v3817_v3 }
  0x22   : > { %3246 = vmatmul.mubr.msk.bf16.vlgmr.msra.gmra.mrb[8].mxu1 %vm277_vm0, %v3823_v5 }
  0x23   : > { %3249 = vmatprep.mubr.msk.bf16.mxu1 %vm277_vm0, %v3828_v6 }
  0x2a   : > { %3250 = vmatmul.mubr.msk.bf16.gmra.mrb[12].mxu1 %vm277_vm0, %v3837_v7 }
  0xe5   : > { %v3235_v10 = vpop.f32.mrb[0].mxu1  ;;  %v3259_v59 = vpop.f32.mrb[0].mxu0 }
  0xe6   : > { %v324_v12 = vpop.f32.mrb[1].mxu1  ;;  %v333_v14 = vadd.f32 %v3235_v10, %v2874_v11  ;;  %v513_v60 = vadd.f32 %v3259_v59, %v2902_v57  ;;  %v504_v61 = vpop.f32.mrb[1].mxu0 }
  0xe7   : > { %v3236_v13 = vpop.f32.mrb[2].mxu1  ;;  %v325_v17 = vadd.f32 %v2874_v11, %v324_v12  ;;  %v505_v62 = vadd.f32 %v2902_v57, %v504_v61  ;;  %v3260_v63 = vpop.f32.mrb[2].mxu0 }
  0xe8   : > { %v336_v15 = vadd.f32 %v3236_v13, %v2874_v11  ;;  %v327_v16 = vpop.f32.mrb[3].mxu1  ;;  %v516_v0 = vadd.f32 %v3260_v63, %v2902_v57  ;;  %v507_v1 = vpop.f32.mrb[3].mxu0 }
  0xe9   : > { %v328_v18 = vadd.f32 %v2874_v11, %v327_v16  ;;  %v508_v2 = vadd.f32 %v2902_v57, %v507_v1 }
  0xea   : > { %v536_v19 = vpack.c.bf16 %v336_v15, %v333_v14  ;;  %v711_v4 = vpack.c.bf16 %v516_v0, %v513_v60 }
  0xeb   : > { %v535_v20 = vpack.c.bf16 %v328_v18, %v325_v17  ;;  %v710_v8 = vpack.c.bf16 %v508_v2, %v505_v62 }
  0xed   : > { %v3239_v21 = vpop.f32.mrb[4].mxu1  ;;  %3273 = vmatprep.mubr.msk.bf16.mxu1 %vm543_vm1, %v535_v20  ;;  %3281 = vmatprep.subr.bf16.mxu0 %v710_v8 }
  0xee   : > { %v340_v22 = vpop.f32.mrb[5].mxu1  ;;  %v349_v24 = vadd.f32 %v3239_v21, %v2874_v11  ;;  %3282 = vmatpush3.bf16.msra.mxu0 %v710_v8 }
  0xef   : > { %v3240_v23 = vpop.f32.mrb[6].mxu1  ;;  %v341_v27 = vadd.f32 %v2874_v11, %v340_v22  ;;  %3283 = vmatprep.subr.bf16.mxu0 %v711_v4 }
  0xf0   : > { %v352_v25 = vadd.f32 %v3240_v23, %v2874_v11  ;;  %v343_v26 = vpop.f32.mrb[7].mxu1 }
  0xf1   : > { %v344_v28 = vadd.f32 %v2874_v11, %v343_v26 }
  0xf2   : > { %v538_v29 = vpack.c.bf16 %v352_v25, %v349_v24  ;;  %3284 = vmatpush3.bf16.msra.mxu0 %v711_v4  ;;  %v3263_v25 = vpop.f32.mrb[4].mxu0 }
  0xf3   : > { %v537_v30 = vpack.c.bf16 %v344_v28, %v341_v27  ;;  %v520_v26 = vpop.f32.mrb[5].mxu0 }
  0xf4   : > { %v3264_v27 = vpop.f32.mrb[6].mxu0 }
  0xf5   : > { %v3247_v31 = vpop.f32.mrb[8].mxu1  ;;  %v523_v28 = vpop.f32.mrb[7].mxu0 }
  0xf6   : > { %v414_v33 = vpop.f32.mrb[9].mxu1  ;;  %v423_v35 = vadd.f32 %v3247_v31, %v2890_v32  ;;  %v524_v31 = vadd.f32 %v2902_v57, %v523_v28 }
  0xf7   : > { %v3248_v34 = vpop.f32.mrb[10].mxu1  ;;  %v415_v38 = vadd.f32 %v2890_v32, %v414_v33 }
  0xf8   : > { %v426_v36 = vadd.f32 %v3248_v34, %v2890_v32  ;;  %v417_v37 = vpop.f32.mrb[11].mxu1 }
  0xf9   : > { %v418_v39 = vadd.f32 %v2890_v32, %v417_v37 }
  0xfa   : > { %v540_v40 = vpack.c.bf16 %v426_v36, %v423_v35  ;;  %v3931_v35 = vld [vmem:[%s4394_s1 + $0x10] sm:$0xff]   ;;  %v2934_v36 = vld [vmem:[%s4395_s2 + $0x5] ss:$0 sm:$0xff] }
  0xfb   : > { %v539_v41 = vpack.c.bf16 %v418_v39, %v415_v38 }
  0xfc   : > { %v560_v53 = vsel %vm543_vm1, %v540_v40, 0 }
  0xfd   : > { %3565 = vmatprep.subr.msk.bf16.mxu1 %vm543_vm1, %v539_v41  ;;  %v557_v42 = vsel %vm543_vm1, %v539_v41, 0  ;;  %v3251_v43 = vpop.f32.mrb[12].mxu1 }
  0xfe   : > { %3266 = vmatpush3.bf16.xpose.msra.mxu1 %v557_v42  ;;  %v439_v44 = vadd.f32 %v3251_v43, %v2890_v32  ;;  %v430_v45 = vpop.f32.mrb[13].mxu1 }
  0xff   : > { %3566 = vmatprep.subr.msk.bf16.mxu1 %vm543_vm1, %v540_v40  ;;  %v431_v46 = vadd.f32 %v2890_v32, %v430_v45  ;;  %v3252_v47 = vpop.f32.mrb[14].mxu1 }
 0x100   : > { %v442_v48 = vadd.f32 %v3252_v47, %v2890_v32  ;;  %v433_v49 = vpop.f32.mrb[15].mxu1 }
 0x101   : > { %v434_v50 = vadd.f32 %v2890_v32, %v433_v49  ;;  %v532_v32 = vadd.f32 %v3264_v27, %v2902_v57 }
 0x102   : > { %v542_v51 = vpack.c.bf16 %v442_v48, %v439_v44 }
 0x103   : > { %v541_v52 = vpack.c.bf16 %v434_v50, %v431_v46 }
 0x104   : > { %v566_v55 = vsel %vm543_vm1, %v542_v51, 0 }
 0x105   : > { %v563_v54 = vsel %vm543_vm1, %v541_v52, 0 }
 0x106   : > { %3268 = vmatpush3.bf16.xpose.msra.mxu1 %v560_v53 }
 0x107   : > { %3567 = vmatprep.subr.msk.bf16.mxu1 %vm543_vm1, %v541_v52 }
 0x10e   : > { %3270 = vmatpush3.bf16.xpose.msra.mxu1 %v563_v54 }
 0x10f   : > { %3568 = vmatprep.subr.msk.bf16.mxu1 %vm543_vm1, %v542_v51 }
 0x116   : > { %3272 = vmatpush3.bf16.xpose.msra.mxu1 %v566_v55 }
 0x117   : > { %3309 = vmatprep.subr.bf16.mxu1 %v3603_v56 }
 0x11d   : > { %3274 = vmatmul.mubr.msk.bf16.vlgmr.msra.gmra.mrb[16].mxu1 %vm543_vm1, %v536_v19 }
 0x11e   : > { %3277 = vmatprep.mubr.msk.bf16.mxu1 %vm543_vm1, %v537_v30  ;;  %3310 = vmatpush3.bf16.msra.mxu1 %v3603_v56  ;;  %v521_v30 = vadd.f32 %v2902_v57, %v520_v26 }
 0x11f   : > { %3311 = vmatprep.subr.bf16.mxu1 %v3604_v58 }
 0x120   : > { %v712_v33 = vpack.c.bf16 %v524_v31, %v521_v30 }
 0x122   : > { %3312 = vmatpush3.bf16.msra.mxu1 %v3604_v58  ;;  %3285 = vmatprep.subr.bf16.mxu0 %v712_v33 }
 0x123   : > { %3286 = vmatpush3.bf16.msra.mxu0 %v712_v33 }
 0x125   : > { %3278 = vmatmul.mubr.msk.bf16.gmra.mrb[20].mxu1 %vm543_vm1, %v538_v29  ;;  %v529_v29 = vadd.f32 %v3263_v25, %v2902_v57 }
 0x126   : > { %3313 = vmatprep.mubr.msk.bf16.mxu1 %vm277_vm0, %v3817_v3 }
 0x127   : > { %v713_v34 = vpack.c.bf16 %v532_v32, %v529_v29 }
 0x129   : > { %3287 = vmatprep.subr.bf16.mxu0 %v713_v34 }
 0x12a   : > { %3288 = vmatpush3.bf16.msra.mxu0 %v713_v34 }
 0x12b   : > { %3297 = vmatprep.subr.bf16.mxu0 %v3931_v35 }
 0x12d   : > { %3314 = vmatmul.mubr.msk.bf16.vlgmr.msra.gmra.mrb[24].mxu1 %vm277_vm0, %v3823_v5 }
 0x12e   : > { %3317 = vmatprep.mubr.msk.bf16.mxu1 %vm277_vm0, %v3828_v6 }
 0x135   : > { %3318 = vmatmul.mubr.msk.bf16.gmra.mrb[28].mxu1 %vm277_vm0, %v3837_v7 }
 0x1f0   : > { %v3896_v9 = vpop.f32.mrb[16].mxu1 }
 0x1f1   : > { %v3898_v10 = vpop.f32.mrb[17].mxu1  ;;  %v640_v11 = vsel %vm633_vm2, %v3896_v9, -inf }
 0x1f2   : > { %641 = vmax.xlane.f32.xlu1 %v640_v11  ;;  %v3902_v12 = vpop.f32.mrb[18].mxu1  ;;  %v634_v13 = vsel %vm633_vm2, %v3898_v10, -inf }
 0x1f3   : > { %635 = vmax.xlane.f32.xlu0 %v634_v13  ;;  %v3906_v14 = vpop.f32.mrb[19].mxu1  ;;  %v643_v15 = vsel %vm633_vm2, %v3902_v12, -inf }
 0x1f4   : > { %v637_v16 = vsel %vm633_vm2, %v3906_v14, -inf }
 0x1f6   : > { %644 = vmax.xlane.f32.xlu1 %v643_v15 }
 0x1f7   : > { %638 = vmax.xlane.f32.xlu0 %v637_v16 }
 0x1f8   : > { %v3912_v17 = vpop.f32.mrb[20].mxu1 }
 0x1f9   : > { %v3914_v18 = vpop.f32.mrb[21].mxu1  ;;  %v652_v23 = vsel %vm633_vm2, %v3912_v17, -inf }
 0x1fa   : > { %v3916_v19 = vpop.f32.mrb[22].mxu1  ;;  %v646_v20 = vsel %vm633_vm2, %v3914_v18, -inf }
 0x1fb   : > { %647 = vmax.xlane.f32.xlu0 %v646_v20  ;;  %v3920_v21 = vpop.f32.mrb[23].mxu1  ;;  %v655_v24 = vsel %vm633_vm2, %v3916_v19, -inf }
 0x1fc   : > { %v649_v22 = vsel %vm633_vm2, %v3920_v21, -inf }
 0x1fd   : > { %650 = vmax.xlane.f32.xlu1 %v649_v22 }
 0x1ff   : > { %653 = vmax.xlane.f32.xlu0 %v652_v23 }
 0x200   : > { %v3315_v37 = vpop.f32.mrb[24].mxu1 }
 0x201   : > { %656 = vmax.xlane.f32.xlu1 %v655_v24  ;;  %v970_v38 = vadd.f32 %v3315_v37, %v2934_v36  ;;  %v961_v39 = vpop.f32.mrb[25].mxu1 }
 0x202   : > { %v962_v40 = vadd.f32 %v2934_v36, %v961_v39  ;;  %v3316_v41 = vpop.f32.mrb[26].mxu1  ;;  %v3611_v39 = vld [vmem:[%s4394_s1 + $0x90] sm:$0xff]  }
 0x203   : > { %v973_v42 = vadd.f32 %v3316_v41, %v2934_v36  ;;  %v964_v43 = vpop.f32.mrb[27].mxu1 }
 0x204   : > { %v965_v44 = vadd.f32 %v2934_v36, %v964_v43 }
 0x205   : > { %v1087_v45 = vpack.c.bf16 %v973_v42, %v970_v38  ;;  %v3607_v38 = vld [vmem:[%s4394_s1 + $0x20] sm:$0xff]  }
 0x206   : > { %v1086_v46 = vpack.c.bf16 %v965_v44, %v962_v40  ;;  %v3612_v40 = vld [vmem:[%s4394_s1 + $0x98] sm:$0xff]  }
 0x207   : > { %v1106_v57 = vsel %vm543_vm1, %v1087_v45, 0 }
 0x208   : > { %3569 = vmatprep.subr.msk.bf16.mxu1 %vm543_vm1, %v1086_v46  ;;  %v1103_v47 = vsel %vm543_vm1, %v1086_v46, 0  ;;  %v3319_v48 = vpop.f32.mrb[28].mxu1 }
 0x209   : > { %3334 = vmatpush3.bf16.xpose.msra.mxu1 %v1103_v47  ;;  %v986_v49 = vadd.f32 %v3319_v48, %v2934_v36  ;;  %v977_v50 = vpop.f32.mrb[29].mxu1 }
 0x20a   : > { %3570 = vmatprep.subr.msk.bf16.mxu1 %vm543_vm1, %v1087_v45  ;;  %v978_v51 = vadd.f32 %v2934_v36, %v977_v50  ;;  %v3320_v52 = vpop.f32.mrb[30].mxu1  ;;  %v2922_v50 = vld [vmem:[%s4395_s2 + $0x1] ss:$0 sm:$0xff] }
 0x20b   : > { %v989_v53 = vadd.f32 %v3320_v52, %v2934_v36  ;;  %v980_v54 = vpop.f32.mrb[31].mxu1 }
 0x20c   : > { %v981_v55 = vadd.f32 %v2934_v36, %v980_v54 }
 0x20d   : > { %v3940_v56 = vpack.c.bf16 %v989_v53, %v986_v49 }
 0x20e   : > { %v1088_v58 = vpack.c.bf16 %v981_v55, %v978_v51 }
 0x20f   : > { %v1112_v37 = vsel %vm543_vm1, %v3940_v56, 0 }
 0x211   : > { %3336 = vmatpush3.bf16.xpose.msra.mxu1 %v1106_v57 }
 0x212   : > { %3571 = vmatprep.subr.msk.bf16.mxu1 %vm543_vm1, %v1088_v58 }
 0x27f   : > { %v642_v59 = vpop.xlane.xlu1 %641 }
 0x280   : > { %v660_v60 = vsub.f32 %v3896_v9, %v642_v59  ;;  %v636_v61 = vpop.xlane.xlu0 %635 }
 0x281   : > { %v658_v62 = vsub.f32 %v3898_v10, %v636_v61 }
 0x282   : > { %v670_v63 = vmul.f32 1.442695, %v660_v60  ;;  %v3608_v60 = vld [vmem:[%s4394_s1 + $0x28] sm:$0xff]  }
 0x283   : > { %v666_v0 = vmul.f32 1.442695, %v658_v62  ;;  %v645_v1 = vpop.xlane.xlu1 %644 }
 0x284   : > { %v661_v2 = vsub.f32 %v3902_v12, %v645_v1  ;;  %v639_v4 = vpop.xlane.xlu0 %638  ;;  %3621 = vpow2.f32 %v670_v63 }
 0x285   : > { %v659_v8 = vsub.f32 %v3906_v14, %v639_v4  ;;  %3623 = vpow2.f32 %v666_v0  ;;  %v3609_v4 = vld [vmem:[%s4394_s1 + $0x60] sm:$0xff]  }
 0x286   : > { %v672_v11 = vmul.f32 1.442695, %v661_v2 }
 0x287   : > { %v668_v13 = vmul.f32 1.442695, %v659_v8 }
 0x288   : > { %3625 = vpow2.f32 %v672_v11  ;;  %v648_v15 = vpop.xlane.xlu0 %647 }
 0x289   : > { %3627 = vpow2.f32 %v668_v13  ;;  %v662_v9 = vsub.f32 %v3914_v18, %v648_v15 }
 0x28a   : > { %v651_v16 = vpop.xlane.xlu1 %650 }
 0x28b   : > { %v674_v20 = vmul.f32 1.442695, %v662_v9  ;;  %v663_v10 = vsub.f32 %v3920_v21, %v651_v16  ;;  %v3610_v9 = vld [vmem:[%s4394_s1 + $0x68] sm:$0xff]  }
 0x28c   : > { %v654_v22 = vpop.xlane.xlu0 %653 }
 0x28d   : > { %v676_v23 = vmul.f32 1.442695, %v663_v10  ;;  %v664_v12 = vsub.f32 %v3912_v17, %v654_v22  ;;  %3629 = vpow2.f32 %v674_v20  ;;  %v2946_v20 = vld [vmem:[%s4395_s2 + $0x9] ss:$0 sm:$0xff] }
 0x28e   : > { %v657_v24 = vpop.xlane.xlu1 %656  ;;  %v3952_v26 = vpop.eup %3621 }
 0x28f   : > { %3631 = vpow2.f32 %v676_v23  ;;  %v678_v14 = vmul.f32 1.442695, %v664_v12  ;;  %v665_v25 = vsub.f32 %v3916_v19, %v657_v24  ;;  %v3954_v27 = vpop.eup %3623  ;;  %v3606_v19 = vld [vmem:[%s4394_s1 + $0x18] sm:$0xff]  }
 0x291   : > { %v680_v28 = vmul.f32 1.442695, %v665_v25  ;;  %3633 = vpow2.f32 %v678_v14 }
 0x292   : > { %v3956_v18 = vpop.eup %3625 }
 0x293   : > { %v3958_v29 = vpop.eup %3627  ;;  %v707_v21 = vpack.c.bf16 %v3956_v18, %v3952_v26  ;;  %3635 = vpow2.f32 %v680_v28 }
 0x294   : > { %v706_v17 = vpack.c.bf16 %v3958_v29, %v3954_v27 }
 0x296   : > { %3289 = vmatprep.mubr.msk.bf16.mxu0 %vm633_vm2, %v706_v17 }
 0x297   : > { %3290 = vmatmul.mubr.msk.bf16.vlgmr.msra.gmra.mrb[8].mxu0 %vm633_vm2, %v707_v21  ;;  %v3969_v30 = vpop.eup %3629 }
 0x298   : > { %3298 = vmatpush3.bf16.msra.mxu0 %v3931_v35  ;;  %v1109_v35 = vsel %vm543_vm1, %v1088_v58, 0 }
 0x299   : > { %v3972_v31 = vpop.eup %3631  ;;  %3299 = vmatprep.subr.bf16.mxu0 %v3606_v19  ;;  %3338 = vmatpush3.bf16.xpose.msra.mxu1 %v1109_v35 }
 0x29a   : > { %v708_v32 = vpack.c.bf16 %v3972_v31, %v3969_v30  ;;  %3572 = vmatprep.subr.msk.bf16.mxu1 %vm543_vm1, %v3940_v56 }
 0x29b   : > { %v3976_v33 = vpop.eup %3633 }
 0x29c   : > { %3293 = vmatprep.mubr.msk.bf16.mxu0 %vm633_vm2, %v708_v32  ;;  %3300 = vmatpush3.bf16.msra.mxu0 %v3606_v19 }
 0x29d   : > { %v3979_v34 = vpop.eup %3635  ;;  %3321 = vmatprep.subr.bf16.mxu0 %v3611_v39 }
 0x29e   : > { %v709_v36 = vpack.c.bf16 %v3979_v34, %v3976_v33 }
 0x2a0   : > { %3294 = vmatmul.mubr.msk.bf16.gmra.mrb[12].mxu0 %vm633_vm2, %v709_v36 }
 0x2a1   : > { %3301 = vmatprep.mubr.msk.bf16.mxu0 %vm277_vm0, %v3817_v3  ;;  %3340 = vmatpush3.bf16.xpose.msra.mxu1 %v1112_v37 }
 0x2a2   : > { %3385 = vmatprep.subr.bf16.mxu1 %v3607_v38 }
 0x2a8   : > { %3302 = vmatmul.mubr.msk.bf16.vlgmr.msra.gmra.mrb[16].mxu0 %vm277_vm0, %v3823_v5 }
 0x2a9   : > { %3305 = vmatprep.mubr.msk.bf16.mxu0 %vm277_vm0, %v3828_v6  ;;  %3322 = vmatpush3.bf16.msra.mxu0 %v3611_v39 }
 0x2aa   : > { %3323 = vmatprep.subr.bf16.mxu0 %v3612_v40 }
 0x2ad   : > { %3324 = vmatpush3.bf16.msra.mxu0 %v3612_v40 }
 0x2b0   : > { %3306 = vmatmul.mubr.msk.bf16.gmra.mrb[20].mxu0 %vm277_vm0, %v3837_v7 }
 0x2b1   : > { %3325 = vmatprep.mubr.msk.bf16.mxu0 %vm277_vm0, %v3817_v3 }
 0x2b8   : > { %3326 = vmatmul.mubr.msk.bf16.vlgmr.msra.gmra.mrb[24].mxu0 %vm277_vm0, %v3823_v5 }
 0x2b9   : > { %3329 = vmatprep.mubr.msk.bf16.mxu0 %vm277_vm0, %v3828_v6 }
 0x2c0   : > { %3330 = vmatmul.mubr.msk.bf16.gmra.mrb[28].mxu0 %vm277_vm0, %v3837_v7 }
 0x36a   : > { %v4014_v41 = vpop.f32.mrb[8].mxu0 }
 0x36b   : > { %v4016_v42 = vpop.f32.mrb[9].mxu0 }
 0x36c   : > { %v4018_v43 = vpop.f32.mrb[10].mxu0 }
 0x36d   : > { %v4020_v44 = vpop.f32.mrb[11].mxu0 }
 0x373   : > { %v4022_v45 = vpop.f32.mrb[12].mxu0 }
 0x374   : > { %v4024_v46 = vpop.f32.mrb[13].mxu0 }
 0x375   : > { %v4026_v47 = vpop.f32.mrb[14].mxu0 }
 0x376   : > { %v4028_v48 = vpop.f32.mrb[15].mxu0 }
 0x37b   : > { %v3303_v49 = vpop.f32.mrb[16].mxu0 }
 0x37c   : > { %v871_v51 = vpop.f32.mrb[17].mxu0  ;;  %v880_v53 = vadd.f32 %v3303_v49, %v2922_v50 }
 0x37d   : > { %v3304_v52 = vpop.f32.mrb[18].mxu0  ;;  %v872_v56 = vadd.f32 %v2922_v50, %v871_v51 }
 0x37e   : > { %v883_v54 = vadd.f32 %v3304_v52, %v2922_v50  ;;  %v874_v55 = vpop.f32.mrb[19].mxu0 }
 0x37f   : > { %v875_v57 = vadd.f32 %v2922_v50, %v874_v55 }
 0x380   : > { %v1083_v58 = vpack.c.bf16 %v883_v54, %v880_v53  ;;  %v2975_v53 = vld [vmem:[%s4395_s2 + $0x2] ss:$0 sm:$0xff] }
 0x381   : > { %v1082_v59 = vpack.c.bf16 %v875_v57, %v872_v56 }
 0x383   : > { %v3307_v61 = vpop.f32.mrb[20].mxu0  ;;  %3341 = vmatprep.mubr.msk.bf16.mxu1 %vm543_vm1, %v1082_v59 }
 0x384   : > { %v887_v62 = vpop.f32.mrb[21].mxu0  ;;  %3342 = vmatmul.mubr.msk.bf16.vlgmr.msra.gmra.mrb[32].mxu1 %vm543_vm1, %v1083_v58  ;;  %v896_v0 = vadd.f32 %v3307_v61, %v2922_v50 }
 0x385   : > { %v3308_v63 = vpop.f32.mrb[22].mxu0  ;;  %3386 = vmatpush3.bf16.msra.mxu1 %v3607_v38  ;;  %v888_v8 = vadd.f32 %v2922_v50, %v887_v62 }
 0x386   : > { %v899_v1 = vadd.f32 %v3308_v63, %v2922_v50  ;;  %v890_v2 = vpop.f32.mrb[23].mxu0  ;;  %3387 = vmatprep.subr.bf16.mxu1 %v3608_v60 }
 0x387   : > { %v891_v11 = vadd.f32 %v2922_v50, %v890_v2 }
 0x388   : > { %v1085_v13 = vpack.c.bf16 %v899_v1, %v896_v0 }
 0x389   : > { %v1084_v15 = vpack.c.bf16 %v891_v11, %v888_v8  ;;  %3388 = vmatpush3.bf16.msra.mxu1 %v3608_v60 }
 0x38a   : > { %3397 = vmatprep.subr.bf16.mxu1 %v3609_v4 }
 0x38b   : > { %3345 = vmatprep.mubr.msk.bf16.mxu1 %vm543_vm1, %v1084_v15  ;;  %v3327_v16 = vpop.f32.mrb[24].mxu0 }
 0x38c   : > { %3346 = vmatmul.mubr.msk.bf16.gmra.mrb[36].mxu1 %vm543_vm1, %v1085_v13  ;;  %v1060_v10 = vadd.f32 %v3327_v16, %v2946_v20  ;;  %v1051_v22 = vpop.f32.mrb[25].mxu0 }
 0x38d   : > { %3389 = vmatprep.mubr.msk.bf16.mxu1 %vm277_vm0, %v3817_v3  ;;  %v1052_v23 = vadd.f32 %v2946_v20, %v1051_v22  ;;  %v3328_v12 = vpop.f32.mrb[26].mxu0 }
 0x38e   : > { %v1063_v24 = vadd.f32 %v3328_v12, %v2946_v20  ;;  %v1054_v14 = vpop.f32.mrb[27].mxu0 }
 0x38f   : > { %v1055_v25 = vadd.f32 %v2946_v20, %v1054_v14 }
 0x391   : > { %v1255_v21 = vpack.c.bf16 %v1055_v25, %v1052_v23 }
 0x393   : > { %v3331_v28 = vpop.f32.mrb[28].mxu0  ;;  %3349 = vmatprep.subr.bf16.mxu0 %v1255_v21 }
 0x394   : > { %3390 = vmatmul.mubr.msk.bf16.vlgmr.msra.gmra.mrb[40].mxu1 %vm277_vm0, %v3823_v5  ;;  %3350 = vmatpush3.bf16.msra.mxu0 %v1255_v21  ;;  %v1067_v58 = vpop.f32.mrb[29].mxu0  ;;  %v1076_v0 = vadd.f32 %v3331_v28, %v2946_v20 }
 0x395   : > { %3393 = vmatprep.mubr.msk.bf16.mxu1 %vm277_vm0, %v3828_v6  ;;  %3398 = vmatpush3.bf16.msra.mxu1 %v3609_v4  ;;  %v3332_v61 = vpop.f32.mrb[30].mxu0  ;;  %v1068_v4 = vadd.f32 %v2946_v20, %v1067_v58 }
 0x396   : > { %3399 = vmatprep.subr.bf16.mxu1 %v3610_v9  ;;  %v1070_v1 = vpop.f32.mrb[31].mxu0  ;;  %v1079_v13 = vadd.f32 %v3332_v61, %v2946_v20 }
 0x397   : > { %v1071_v8 = vadd.f32 %v2946_v20, %v1070_v1  ;;  %v2987_v20 = vld [vmem:[%s4395_s2 + $0x6] ss:$0 sm:$0xff] }
 0x398   : > { %v1258_v16 = vpack.c.bf16 %v1079_v13, %v1076_v0 }
 0x399   : > { %3400 = vmatpush3.bf16.msra.mxu1 %v3610_v9  ;;  %v1257_v9 = vpack.c.bf16 %v1071_v8, %v1068_v4 }
 0x39c   : > { %3394 = vmatmul.mubr.msk.bf16.gmra.mrb[44].mxu1 %vm277_vm0, %v3837_v7 }
 0x39d   : > { %3401 = vmatprep.mubr.msk.bf16.mxu1 %vm277_vm0, %v3817_v3 }
 0x3a4   : > { %3402 = vmatmul.mubr.msk.bf16.vlgmr.msra.gmra.mrb[48].mxu1 %vm277_vm0, %v3823_v5  ;;  %v1256_v5 = vpack.c.bf16 %v1063_v24, %v1060_v10 }
 0x3a5   : > { %3405 = vmatprep.mubr.msk.bf16.mxu1 %vm277_vm0, %v3828_v6 }
 0x3a6   : > { %3351 = vmatprep.subr.bf16.mxu0 %v1256_v5 }
 0x3a7   : > { %3352 = vmatpush3.bf16.msra.mxu0 %v1256_v5 }
 0x3a8   : > { %3353 = vmatprep.subr.bf16.mxu0 %v1257_v9 }
 0x3ab   : > { %3354 = vmatpush3.bf16.msra.mxu0 %v1257_v9 }
 0x3ac   : > { %3406 = vmatmul.mubr.msk.bf16.gmra.mrb[52].mxu1 %vm277_vm0, %v3837_v7  ;;  %3355 = vmatprep.subr.bf16.mxu0 %v1258_v16 }
 0x3af   : > { %3356 = vmatpush3.bf16.msra.mxu0 %v1258_v16 }
 0x457   : > { %v4065_v6 = vpop.f32.mrb[32].mxu1 }
 0x458   : > { %v4067_v7 = vpop.f32.mrb[33].mxu1  ;;  %v1185_v35 = vsel %vm633_vm2, %v4065_v6, -inf }
 0x459   : > { %v4069_v17 = vpop.f32.mrb[34].mxu1  ;;  %v1179_v19 = vsel %vm633_vm2, %v4067_v7, -inf }
 0x45a   : > { %1180 = vmax.xlane.f32.xlu0 %v1179_v19  ;;  %v4073_v32 = vpop.f32.mrb[35].mxu1  ;;  %v1188_v38 = vsel %vm633_vm2, %v4069_v17, -inf }
 0x45b   : > { %v1182_v36 = vsel %vm633_vm2, %v4073_v32, -inf }
 0x45c   : > { %1183 = vmax.xlane.f32.xlu1 %v1182_v36 }
 0x45e   : > { %1186 = vmax.xlane.f32.xlu0 %v1185_v35 }
 0x45f   : > { %v4079_v37 = vpop.f32.mrb[36].mxu1 }
 0x460   : > { %1189 = vmax.xlane.f32.xlu1 %v1188_v38  ;;  %v4083_v39 = vpop.f32.mrb[37].mxu1  ;;  %v1197_v52 = vsel %vm633_vm2, %v4079_v37, -inf }
 0x461   : > { %v4085_v40 = vpop.f32.mrb[38].mxu1  ;;  %v1191_v49 = vsel %vm633_vm2, %v4083_v39, -inf }
 0x462   : > { %1192 = vmax.xlane.f32.xlu0 %v1191_v49  ;;  %v4089_v50 = vpop.f32.mrb[39].mxu1  ;;  %v1200_v54 = vsel %vm633_vm2, %v4085_v40, -inf }
 0x463   : > { %v1194_v51 = vsel %vm633_vm2, %v4089_v50, -inf }
 0x464   : > { %1195 = vmax.xlane.f32.xlu1 %v1194_v51 }
 0x466   : > { %1198 = vmax.xlane.f32.xlu0 %v1197_v52 }
 0x467   : > { %v3391_v55 = vpop.f32.mrb[40].mxu1 }
 0x468   : > { %1201 = vmax.xlane.f32.xlu1 %v1200_v54  ;;  %v4100_v56 = vadd.f32 %v3391_v55, %v2975_v53  ;;  %v1578_v57 = vpop.f32.mrb[41].mxu1 }
 0x469   : > { %v1579_v59 = vadd.f32 %v2975_v53, %v1578_v57  ;;  %v3392_v60 = vpop.f32.mrb[42].mxu1 }
 0x46a   : > { %v1590_v62 = vadd.f32 %v3392_v60, %v2975_v53  ;;  %v1581_v63 = vpop.f32.mrb[43].mxu1 }
 0x46b   : > { %v1582_v2 = vadd.f32 %v2975_v53, %v1581_v63 }
 0x46c   : > { %v1790_v11 = vpack.c.bf16 %v1590_v62, %v4100_v56 }
 0x46d   : > { %v1789_v15 = vpack.c.bf16 %v1582_v2, %v1579_v59 }
 0x46f   : > { %v3395_v10 = vpop.f32.mrb[44].mxu1  ;;  %3429 = vmatprep.mubr.msk.bf16.mxu1 %vm543_vm1, %v1789_v15 }
 0x470   : > { %v1603_v22 = vadd.f32 %v3395_v10, %v2975_v53  ;;  %v1594_v23 = vpop.f32.mrb[45].mxu1 }
 0x471   : > { %v1595_v12 = vadd.f32 %v2975_v53, %v1594_v23  ;;  %v3396_v24 = vpop.f32.mrb[46].mxu1 }
 0x472   : > { %v1606_v14 = vadd.f32 %v3396_v24, %v2975_v53  ;;  %v1597_v25 = vpop.f32.mrb[47].mxu1 }
 0x473   : > { %v1598_v28 = vadd.f32 %v2975_v53, %v1597_v25 }
 0x474   : > { %v1792_v5 = vpack.c.bf16 %v1606_v14, %v1603_v22 }
 0x475   : > { %v1791_v21 = vpack.c.bf16 %v1598_v28, %v1595_v12 }
 0x477   : > { %v3403_v19 = vpop.f32.mrb[48].mxu1 }
 0x478   : > { %v1677_v36 = vadd.f32 %v3403_v19, %v2987_v20  ;;  %v1668_v35 = vpop.f32.mrb[49].mxu1 }
 0x479   : > { %v1669_v38 = vadd.f32 %v2987_v20, %v1668_v35  ;;  %v3404_v49 = vpop.f32.mrb[50].mxu1 }
 0x47a   : > { %v1680_v51 = vadd.f32 %v3404_v49, %v2987_v20  ;;  %v1671_v52 = vpop.f32.mrb[51].mxu1 }
 0x47b   : > { %v1672_v54 = vadd.f32 %v2987_v20, %v1671_v52 }
 0x47c   : > { %v1794_v55 = vpack.c.bf16 %v1680_v51, %v1677_v36 }
 0x47d   : > { %v1793_v56 = vpack.c.bf16 %v1672_v54, %v1669_v38 }
 0x47e   : > { %v1813_v2 = vsel %vm543_vm1, %v1794_v55, 0 }
 0x47f   : > { %3575 = vmatprep.subr.msk.bf16.mxu1 %vm543_vm1, %v1793_v56  ;;  %v1810_v53 = vsel %vm543_vm1, %v1793_v56, 0  ;;  %v3407_v57 = vpop.f32.mrb[52].mxu1 }
 0x480   : > { %3422 = vmatpush3.bf16.xpose.msra.mxu1 %v1810_v53  ;;  %v1693_v58 = vadd.f32 %v3407_v57, %v2987_v20  ;;  %v1684_v59 = vpop.f32.mrb[53].mxu1 }
 0x481   : > { %3576 = vmatprep.subr.msk.bf16.mxu1 %vm543_vm1, %v1794_v55  ;;  %v1685_v60 = vadd.f32 %v2987_v20, %v1684_v59  ;;  %v3408_v61 = vpop.f32.mrb[54].mxu1 }
 0x482   : > { %v1696_v62 = vadd.f32 %v3408_v61, %v2987_v20  ;;  %v1687_v63 = vpop.f32.mrb[55].mxu1 }
 0x483   : > { %v1688_v0 = vadd.f32 %v2987_v20, %v1687_v63 }
 0x484   : > { %v1796_v1 = vpack.c.bf16 %v1696_v62, %v1693_v58 }
 0x485   : > { %v1795_v4 = vpack.c.bf16 %v1688_v0, %v1685_v60 }
 0x486   : > { %v1819_v13 = vsel %vm543_vm1, %v1796_v1, 0 }
 0x487   : > { %v1816_v8 = vsel %vm543_vm1, %v1795_v4, 0 }
 0x488   : > { %3424 = vmatpush3.bf16.xpose.msra.mxu1 %v1813_v2  ;;  %v682_v2 = vsel %vm633_vm2, %v3954_v27, 0.0  ;;  %v697_v27 = vsel %vm633_vm2, %v3972_v31, 0.0  ;;  %v4164_v31 = vld [vmem:[%s4396_s3] sm:$0xf] }
 0x489   : > { %3577 = vmatprep.subr.msk.bf16.mxu1 %vm543_vm1, %v1795_v4  ;;  %v685_v4 = vsel %vm633_vm2, %v3958_v29, 0.0  ;;  %v700_v29 = vsel %vm633_vm2, %v3976_v33, 0.0 }
 0x490   : > { %3426 = vmatpush3.bf16.xpose.msra.mxu1 %v1816_v8  ;;  %v688_v8 = vsel %vm633_vm2, %v3952_v26, 0.0  ;;  %v703_v26 = vsel %vm633_vm2, %v3979_v34, 0.0 }
 0x491   : > { %3578 = vmatprep.subr.msk.bf16.mxu1 %vm543_vm1, %v1796_v1 }
 0x498   : > { %3428 = vmatpush3.bf16.xpose.msra.mxu1 %v1819_v13  ;;  %v691_v13 = vsel %vm633_vm2, %v3956_v18, 0.0  ;;  %v2961_v18 = vld [vmem:[%s4396_s3 + $0x4] sm:$0xf] }
 0x499   : > { %3573 = vmatprep.subr.msk.bf16.mxu0 %vm1370_vm3, %v2961_v18 }
 0x49f   : > { %3430 = vmatmul.mubr.msk.bf16.vlgmr.msra.gmra.mrb[56].mxu1 %vm543_vm1, %v1790_v11 }
 0x4a0   : > { %3433 = vmatprep.mubr.msk.bf16.mxu1 %vm543_vm1, %v1791_v21 }
 0x4a7   : > { %3434 = vmatmul.mubr.msk.bf16.gmra.mrb[60].mxu1 %vm543_vm1, %v1792_v5 }
 0x4a8   : > { %3467 = vmatprep.mubr.msk.bf16.mxu1 %vm277_vm0, %v3817_v3 }
 0x4e7   : > { %v1181_v15 = vpop.xlane.xlu0 %1180 }
 0x4e8   : > { %v1203_v9 = vsub.f32 %v4067_v7, %v1181_v15  ;;  %v694_v15 = vsel %vm633_vm2, %v3969_v30, 0.0  ;;  %v1372_v30 = vsel %vm1370_vm3, %v2961_v18, 0 }
 0x4e9   : > { %v1184_v16 = vpop.xlane.xlu1 %1183 }
 0x4ea   : > { %v1211_v10 = vmul.f32 1.442695, %v1203_v9  ;;  %v1204_v22 = vsub.f32 %v4073_v32, %v1184_v16 }
 0x4eb   : > { %v1187_v23 = vpop.xlane.xlu0 %1186 }
 0x4ec   : > { %3637 = vpow2.f32 %v1211_v10  ;;  %v1213_v12 = vmul.f32 1.442695, %v1204_v22  ;;  %v1205_v24 = vsub.f32 %v4065_v6, %v1187_v23 }
 0x4ed   : > { %v1190_v11 = vpop.xlane.xlu1 %1189 }
 0x4ee   : > { %3639 = vpow2.f32 %v1213_v12  ;;  %v1215_v14 = vmul.f32 1.442695, %v1205_v24  ;;  %v1206_v25 = vsub.f32 %v4069_v17, %v1190_v11 }
 0x4ef   : > { %v1193_v28 = vpop.xlane.xlu0 %1192 }
 0x4f0   : > { %3641 = vpow2.f32 %v1215_v14  ;;  %v1217_v3 = vmul.f32 1.442695, %v1206_v25  ;;  %v1207_v5 = vsub.f32 %v4083_v39, %v1193_v28 }
 0x4f1   : > { %v1196_v7 = vpop.xlane.xlu1 %1195 }
 0x4f2   : > { %3643 = vpow2.f32 %v1217_v3  ;;  %v1219_v21 = vmul.f32 1.442695, %v1207_v5  ;;  %v1208_v32 = vsub.f32 %v4089_v50, %v1196_v7 }
 0x4f3   : > { %v1199_v20 = vpop.xlane.xlu0 %1198 }
 0x4f4   : > { %3645 = vpow2.f32 %v1219_v21  ;;  %v1221_v19 = vmul.f32 1.442695, %v1208_v32  ;;  %v1209_v6 = vsub.f32 %v4079_v37, %v1199_v20 }
 0x4f5   : > { %v1202_v36 = vpop.xlane.xlu1 %1201 }
 0x4f6   : > { %v3638_v35 = vpop.eup %3637  ;;  %3647 = vpow2.f32 %v1221_v19  ;;  %v1223_v38 = vmul.f32 1.442695, %v1209_v6  ;;  %v1210_v17 = vsub.f32 %v4085_v40, %v1202_v36 }
 0x4f7   : > { %v1227_v49 = vsel %vm633_vm2, %v3638_v35, 0.0 }
 0x4f8   : > { %v3640_v51 = vpop.eup %3639  ;;  %3649 = vpow2.f32 %v1223_v38  ;;  %v1225_v39 = vmul.f32 1.442695, %v1210_v17  ;;  %1228 = vadd.xlane.f32.xlu0 %v1227_v49 }
 0x4f9   : > { %v1230_v52 = vsel %vm633_vm2, %v3640_v51, 0.0  ;;  %v1251_v50 = vpack.c.bf16 %v3640_v51, %v3638_v35 }
 0x4fa   : > { %v3642_v54 = vpop.eup %3641  ;;  %3651 = vpow2.f32 %v1225_v39  ;;  %1231 = vadd.xlane.f32.xlu1 %v1230_v52 }
 0x4fb   : > { %3357 = vmatprep.mubr.msk.bf16.mxu0 %vm633_vm2, %v1251_v50  ;;  %v1233_v37 = vsel %vm633_vm2, %v3642_v54, 0.0 }
 0x4fc   : > { %v3644_v55 = vpop.eup %3643  ;;  %1234 = vadd.xlane.f32.xlu0 %v1233_v37 }
 0x4fd   : > { %v1252_v56 = vpack.c.bf16 %v3644_v55, %v3642_v54  ;;  %v1236_v40 = vsel %vm633_vm2, %v3644_v55, 0.0 }
 0x4fe   : > { %v3646_v53 = vpop.eup %3645  ;;  %1237 = vadd.xlane.f32.xlu1 %v1236_v40 }
 0x4ff   : > { %3358 = vmatmul.mubr.msk.bf16.vlgmr.msra.gmra.mrb[32].mxu0 %vm633_vm2, %v1252_v56  ;;  %v1239_v57 = vsel %vm633_vm2, %v3646_v53, 0.0 }
 0x500   : > { %v3648_v58 = vpop.eup %3647  ;;  %1240 = vadd.xlane.f32.xlu0 %v1239_v57  ;;  %3366 = vmatpush3.bf16.msra.mxu0 %v1372_v30 }
 0x501   : > { %v1242_v59 = vsel %vm633_vm2, %v3648_v58, 0.0  ;;  %v1253_v60 = vpack.c.bf16 %v3648_v58, %v3646_v53  ;;  %3574 = vmatprep.subr.msk.bf16.mxu0 %vm1370_vm3, %v4164_v31 }
 0x502   : > { %v3650_v61 = vpop.eup %3649  ;;  %1243 = vadd.xlane.f32.xlu1 %v1242_v59 }
 0x503   : > { %3361 = vmatprep.mubr.msk.bf16.mxu0 %vm633_vm2, %v1253_v60  ;;  %v1245_v62 = vsel %vm633_vm2, %v3650_v61, 0.0 }
 0x504   : > { %v3652_v63 = vpop.eup %3651  ;;  %1246 = vadd.xlane.f32.xlu0 %v1245_v62 }
 0x505   : > { %v1248_v0 = vsel %vm633_vm2, %v3652_v63, 0.0  ;;  %v1254_v1 = vpack.c.bf16 %v3652_v63, %v3650_v61 }
 0x506   : > { %1249 = vadd.xlane.f32.xlu1 %v1248_v0 }
 0x507   : > { %3362 = vmatmul.mubr.msk.bf16.gmra.mrb[36].mxu0 %vm633_vm2, %v1254_v1 }
 0x508   : > { %683 = vadd.xlane.f32.xlu0 %v682_v2 }
 0x50a   : > { %686 = vadd.xlane.f32.xlu1 %v685_v4 }
 0x50c   : > { %689 = vadd.xlane.f32.xlu0 %v688_v8 }
 0x50e   : > { %692 = vadd.xlane.f32.xlu1 %v691_v13 }
 0x510   : > { %695 = vadd.xlane.f32.xlu0 %v694_v15 }
 0x512   : > { %698 = vadd.xlane.f32.xlu1 %v697_v27 }
 0x514   : > { %701 = vadd.xlane.f32.xlu0 %v700_v29 }
 0x516   : > { %704 = vadd.xlane.f32.xlu1 %v703_v26 }
 0x572   : > { %v4168_v33 = vpop.f32.mrb[56].mxu1 }
 0x573   : > { %v4170_v34 = vpop.f32.mrb[57].mxu1  ;;  %v1892_v23 = vsel %vm633_vm2, %v4168_v33, -inf }
 0x574   : > { %v4172_v9 = vpop.f32.mrb[58].mxu1  ;;  %v1886_v16 = vsel %vm633_vm2, %v4170_v34, -inf }
 0x575   : > { %v4176_v10 = vpop.f32.mrb[59].mxu1  ;;  %1887 = vmax.xlane.f32.xlu0 %v1886_v16  ;;  %v1895_v12 = vsel %vm633_vm2, %v4172_v9, -inf }
 0x576   : > { %v1889_v22 = vsel %vm633_vm2, %v4176_v10, -inf }
 0x577   : > { %1890 = vmax.xlane.f32.xlu1 %v1889_v22 }
 0x579   : > { %1893 = vmax.xlane.f32.xlu0 %v1892_v23 }
 0x57a   : > { %v4184_v24 = vpop.f32.mrb[60].mxu1 }
 0x57b   : > { %v4186_v11 = vpop.f32.mrb[61].mxu1  ;;  %1896 = vmax.xlane.f32.xlu1 %v1895_v12  ;;  %v1904_v5 = vsel %vm633_vm2, %v4184_v24, -inf  ;;  %v1452_v12 = vsel %vm1370_vm3, %v4164_v31, 0 }
 0x57c   : > { %v4188_v14 = vpop.f32.mrb[62].mxu1  ;;  %v1898_v25 = vsel %vm633_vm2, %v4186_v11, -inf }
 0x57d   : > { %v4192_v28 = vpop.f32.mrb[63].mxu1  ;;  %1899 = vmax.xlane.f32.xlu0 %v1898_v25  ;;  %v1907_v7 = vsel %vm633_vm2, %v4188_v14, -inf  ;;  %v3613_v25 = vld [vmem:[%s4394_s1 + $0xa0] sm:$0xff]  }
 0x57e   : > { %v1901_v3 = vsel %vm633_vm2, %v4192_v28, -inf }
 0x57f   : > { %1902 = vmax.xlane.f32.xlu1 %v1901_v3 }
 0x581   : > { %1905 = vmax.xlane.f32.xlu0 %v1904_v5 }
 0x583   : > { %1908 = vmax.xlane.f32.xlu1 %v1907_v7 }
 0x585   : > { %v1229_v21 = vpop.xlane.xlu0 %1228 }
 0x587   : > { %v1232_v32 = vpop.xlane.xlu1 %1231 }
 0x589   : > { %v1235_v20 = vpop.xlane.xlu0 %1234 }
 0x58b   : > { %v1238_v19 = vpop.xlane.xlu1 %1237 }
 0x58d   : > { %v1241_v6 = vpop.xlane.xlu0 %1240 }
 0x58f   : > { %v1244_v36 = vpop.xlane.xlu1 %1243 }
 0x591   : > { %v1247_v35 = vpop.xlane.xlu0 %1246 }
 0x593   : > { %v1250_v38 = vpop.xlane.xlu1 %1249 }
 0x595   : > { %v684_v17 = vpop.xlane.xlu0 %683 }
 0x596   : > { %3653 = vrcp.f32 %v684_v17 }
 0x597   : > { %v687_v49 = vpop.xlane.xlu1 %686 }
 0x598   : > { %3655 = vrcp.f32 %v687_v49 }
 0x599   : > { %v690_v51 = vpop.xlane.xlu0 %689 }
 0x59a   : > { %3657 = vrcp.f32 %v690_v51  ;;  %v3614_v51 = vld [vmem:[%s4394_s1 + $0xa8] sm:$0xff]  }
 0x59b   : > { %v693_v39 = vpop.xlane.xlu1 %692 }
 0x59c   : > { %3659 = vrcp.f32 %v693_v39  ;;  %v4231_v39 = vld [vmem:[%s3814_s29] sm:$0xff]  }
 0x59d   : > { %v696_v52 = vpop.xlane.xlu0 %695 }
 0x59e   : > { %3661 = vrcp.f32 %v696_v52  ;;  %v4236_v52 = vld [vmem:[%s3814_s29 + $0x8] sm:$0xff]  }
 0x59f   : > { %v699_v50 = vpop.xlane.xlu1 %698 }
 0x5a0   : > { %v3654_v54 = vpop.eup %3653  ;;  %3663 = vrcp.f32 %v699_v50  ;;  %v4241_v50 = vld [vmem:[%s3814_s29 + $0x10] sm:$0xff]  }
 0x5a1   : > { %v702_v37 = vpop.xlane.xlu0 %701  ;;  %v4201_v40 = vmul.f32 %v3654_v54, %v4016_v42 }
 0x5a2   : > { %v3656_v55 = vpop.eup %3655  ;;  %3665 = vrcp.f32 %v702_v37  ;;  %v4246_v37 = vld [vmem:[%s3814_s29 + $0x18] sm:$0xff]  }
 0x5a3   : > { %v705_v56 = vpop.xlane.xlu1 %704  ;;  %v4204_v53 = vmul.f32 %v3656_v55, %v4020_v44 }
 0x5a4   : > { %v3658_v57 = vpop.eup %3657  ;;  %3667 = vrcp.f32 %v705_v56 }
 0x5a5   : > { %v807_v58 = vpack.c.bf16 %v4204_v53, %v4201_v40  ;;  %v801_v60 = vmul.f32 %v3658_v57, %v4014_v41  ;;  %3669 = vrcp.f32 %v1229_v21 }
 0x5a6   : > { %v3660_v59 = vpop.eup %3659  ;;  %3671 = vrcp.f32 %v1235_v20 }
 0x5a7   : > { %v802_v61 = vmul.f32 %v3660_v59, %v4018_v43  ;;  %3673 = vrcp.f32 %v1238_v19 }
 0x5a8   : > { %v3662_v62 = vpop.eup %3661  ;;  %3675 = vrcp.f32 %v1232_v32 }
 0x5a9   : > { %v808_v63 = vpack.c.bf16 %v802_v61, %v801_v60  ;;  %v803_v1 = vmul.f32 %v3662_v62, %v4024_v46  ;;  %3677 = vrcp.f32 %v1241_v6 }
 0x5aa   : > { %v3664_v0 = vpop.eup %3663  ;;  %3679 = vrcp.f32 %v1247_v35 }
 0x5ab   : > { %v804_v42 = vmul.f32 %v3664_v0, %v4028_v48  ;;  %3681 = vrcp.f32 %v1250_v38 }
 0x5ac   : > { %v3666_v2 = vpop.eup %3665  ;;  %3683 = vrcp.f32 %v1244_v36 }
 0x5ad   : > { %v809_v44 = vpack.c.bf16 %v804_v42, %v803_v1  ;;  %v805_v8 = vmul.f32 %v3666_v2, %v4022_v45 }
 0x5ae   : > { %v3668_v4 = vpop.eup %3667 }
 0x5af   : > { %v806_v13 = vmul.f32 %v3668_v4, %v4026_v47  ;;  %v3670_v41 = vpop.eup %3669 }
 0x5b0   : > { %v3672_v46 = vpop.eup %3671 }
 0x5b1   : > { %v810_v15 = vpack.c.bf16 %v806_v13, %v805_v8  ;;  %v3674_v27 = vpop.eup %3673 }
 0x5b2   : > { %v3676_v26 = vpop.eup %3675 }
 0x5b3   : > { %v3678_v3 = vpop.eup %3677 }
 0x5b4   : > { %v3680_v7 = vpop.eup %3679 }
 0x5b5   : > { %v3682_v32 = vpop.eup %3681 }
 0x5b6   : > { %v3684_v19 = vpop.eup %3683 }
 0x5d2   : > { %v3359_v43 = vpop.f32.mrb[32].mxu0 }
 0x5d3   : > { %v1305_v48 = vpop.f32.mrb[33].mxu0  ;;  %v1346_v18 = vmul.f32 %v3672_v46, %v3359_v43 }
 0x5d4   : > { %v3360_v29 = vpop.f32.mrb[34].mxu0  ;;  %v1344_v47 = vmul.f32 %v3670_v41, %v1305_v48 }
 0x5d5   : > { %v1347_v45 = vmul.f32 %v3674_v27, %v3360_v29  ;;  %v1308_v30 = vpop.f32.mrb[35].mxu0 }
 0x5d6   : > { %v1345_v16 = vmul.f32 %v3676_v26, %v1308_v30 }
 0x5d7   : > { %v1353_v22 = vpack.c.bf16 %v1347_v45, %v1346_v18 }
 0x5d8   : > { %v1352_v23 = vpack.c.bf16 %v1345_v16, %v1344_v47 }
 0x5da   : > { %v3363_v5 = vpop.f32.mrb[36].mxu0  ;;  %3367 = vmatprep.mubr.msk.bf16.mxu0 %vm543_vm1, %v1352_v23 }
 0x5db   : > { %v1321_v21 = vpop.f32.mrb[37].mxu0  ;;  %3368 = vmatmul.mubr.msk.bf16.vlgmr.msra.gmra.mrb[40].mxu0 %vm543_vm1, %v1353_v22  ;;  %v1350_v6 = vmul.f32 %v3680_v7, %v3363_v5 }
 0x5dc   : > { %v3364_v20 = vpop.f32.mrb[38].mxu0  ;;  %3376 = vmatpush3.bf16.msra.mxu0 %v1452_v12  ;;  %v1348_v31 = vmul.f32 %v3678_v3, %v1321_v21  ;;  %v2999_v3 = vld [vmem:[%s4395_s2 + $0xa] ss:$0 sm:$0xff] }
 0x5dd   : > { %v1351_v36 = vmul.f32 %v3682_v32, %v3364_v20  ;;  %v1324_v35 = vpop.f32.mrb[39].mxu0  ;;  %3409 = vmatprep.subr.bf16.mxu0 %v3613_v25 }
 0x5de   : > { %v1349_v38 = vmul.f32 %v3684_v19, %v1324_v35 }
 0x5df   : > { %v1355_v17 = vpack.c.bf16 %v1351_v36, %v1350_v6 }
 0x5e0   : > { %v1354_v49 = vpack.c.bf16 %v1349_v38, %v1348_v31 }
 0x5e2   : > { %3371 = vmatprep.mubr.msk.bf16.mxu0 %vm543_vm1, %v1354_v49 }
 0x5e3   : > { %3372 = vmatmul.mubr.msk.bf16.gmra.mrb[44].mxu0 %vm543_vm1, %v1355_v17 }
 0x5e4   : > { %3377 = vmatprep.mubr.msk.bf16.mxu0 %vm543_vm1, %v807_v58 }
 0x5eb   : > { %3378 = vmatmul.mubr.msk.bf16.vlgmr.msra.gmra.mrb[40].mxu0 %vm543_vm1, %v808_v63 }
 0x5ec   : > { %3381 = vmatprep.mubr.msk.bf16.mxu0 %vm543_vm1, %v809_v44  ;;  %3410 = vmatpush3.bf16.msra.mxu0 %v3613_v25 }
 0x5ed   : > { %3411 = vmatprep.subr.bf16.mxu0 %v3614_v51 }
 0x5f0   : > { %3412 = vmatpush3.bf16.msra.mxu0 %v3614_v51 }
 0x5f3   : > { %3382 = vmatmul.mubr.msk.bf16.gmra.mrb[44].mxu0 %vm543_vm1, %v810_v15 }
 0x5f4   : > { %3413 = vmatprep.mubr.msk.bf16.mxu0 %vm277_vm0, %v4231_v39 }
 0x5fb   : > { %3414 = vmatmul.mubr.msk.bf16.vlgmr.msra.gmra.mrb[48].mxu0 %vm277_vm0, %v4236_v52 }
 0x5fc   : > { %3417 = vmatprep.mubr.msk.bf16.mxu0 %vm277_vm0, %v4241_v50 }
 0x602   : > { %v1888_v54 = vpop.xlane.xlu0 %1887 }
 0x603   : > { %3418 = vmatmul.mubr.msk.bf16.gmra.mrb[52].mxu0 %vm277_vm0, %v4246_v37  ;;  %v1910_v55 = vsub.f32 %v4170_v34, %v1888_v54 }
 0x604   : > { %v1891_v56 = vpop.xlane.xlu1 %1890 }
 0x605   : > { %v1918_v40 = vmul.f32 1.442695, %v1910_v55  ;;  %v1911_v53 = vsub.f32 %v4176_v10, %v1891_v56 }
 0x606   : > { %v1894_v57 = vpop.xlane.xlu0 %1893 }
 0x607   : > { %3685 = vpow2.f32 %v1918_v40  ;;  %v1920_v58 = vmul.f32 1.442695, %v1911_v53  ;;  %v1912_v59 = vsub.f32 %v4168_v33, %v1894_v57  ;;  %v3014_v57 = vld [vmem:[%s4396_s3 + $0x8] sm:$0xf] }
 0x608   : > { %v1897_v60 = vpop.xlane.xlu1 %1896 }
 0x609   : > { %3687 = vpow2.f32 %v1920_v58  ;;  %v1922_v61 = vmul.f32 1.442695, %v1912_v59  ;;  %v1913_v62 = vsub.f32 %v4172_v9, %v1897_v60  ;;  %v2078_v58 = vsel %vm1370_vm3, %v3014_v57, 0  ;;  %v3615_v59 = vld [vmem:[%s4394_s1 + $0x70] sm:$0xff]  }
 0x60a   : > { %v1900_v63 = vpop.xlane.xlu0 %1899  ;;  %v3617_v60 = vld [vmem:[%s4394_s1 + $0x30] sm:$0xff]  }
 0x60b   : > { %3689 = vpow2.f32 %v1922_v61  ;;  %v1924_v0 = vmul.f32 1.442695, %v1913_v62  ;;  %v1914_v1 = vsub.f32 %v4186_v11, %v1900_v63  ;;  %v3618_v61 = vld [vmem:[%s4394_s1 + $0x38] sm:$0xff]   ;;  %3463 = vmatprep.subr.bf16.mxu1 %v3617_v60 }
 0x60c   : > { %v1903_v34 = vpop.xlane.xlu1 %1902  ;;  %3464 = vmatpush3.bf16.msra.mxu1 %v3617_v60  ;;  %v3620_v60 = vld [vmem:[%s4394_s1 + $0xb8] sm:$0xff]  }
 0x60d   : > { %3691 = vpow2.f32 %v1924_v0  ;;  %v1926_v42 = vmul.f32 1.442695, %v1914_v1  ;;  %v1915_v10 = vsub.f32 %v4192_v28, %v1903_v34  ;;  %3465 = vmatprep.subr.bf16.mxu1 %v3618_v61 }
 0x60e   : > { %v1906_v2 = vpop.xlane.xlu0 %1905 }
 0x60f   : > { %3693 = vpow2.f32 %v1926_v42  ;;  %v1928_v44 = vmul.f32 1.442695, %v1915_v10  ;;  %v1916_v33 = vsub.f32 %v4184_v24, %v1906_v2 }
 0x610   : > { %v1909_v4 = vpop.xlane.xlu1 %1908  ;;  %3466 = vmatpush3.bf16.msra.mxu1 %v3618_v61 }
 0x611   : > { %v3686_v8 = vpop.eup %3685  ;;  %3695 = vpow2.f32 %v1928_v44  ;;  %v1930_v13 = vmul.f32 1.442695, %v1916_v33  ;;  %v1917_v9 = vsub.f32 %v4188_v14, %v1909_v4 }
 0x612   : > { %v1934_v15 = vsel %vm633_vm2, %v3686_v8, 0.0 }
 0x613   : > { %v3688_v41 = vpop.eup %3687  ;;  %3697 = vpow2.f32 %v1930_v13  ;;  %v1932_v11 = vmul.f32 1.442695, %v1917_v9  ;;  %1935 = vadd.xlane.f32.xlu0 %v1934_v15  ;;  %3468 = vmatmul.mubr.msk.bf16.vlgmr.msra.gmra.mrb[64].mxu1 %vm277_vm0, %v4236_v52 }
 0x614   : > { %v1937_v43 = vsel %vm633_vm2, %v3688_v41, 0.0  ;;  %v1958_v28 = vpack.c.bf16 %v3688_v41, %v3686_v8  ;;  %3471 = vmatprep.mubr.msk.bf16.mxu1 %vm277_vm0, %v4241_v50 }
 0x615   : > { %v3690_v46 = vpop.eup %3689  ;;  %3699 = vpow2.f32 %v1932_v11  ;;  %1938 = vadd.xlane.f32.xlu1 %v1937_v43 }
 0x616   : > { %v1940_v24 = vsel %vm633_vm2, %v3690_v46, 0.0  ;;  %3445 = vmatprep.mubr.msk.bf16.mxu0 %vm633_vm2, %v1958_v28 }
 0x617   : > { %v3692_v48 = vpop.eup %3691  ;;  %1941 = vadd.xlane.f32.xlu0 %v1940_v24 }
 0x618   : > { %v1959_v27 = vpack.c.bf16 %v3692_v48, %v3690_v46  ;;  %v1943_v14 = vsel %vm633_vm2, %v3692_v48, 0.0 }
 0x619   : > { %v3694_v29 = vpop.eup %3693  ;;  %1944 = vadd.xlane.f32.xlu1 %v1943_v14 }
 0x61a   : > { %v1946_v26 = vsel %vm633_vm2, %v3694_v29, 0.0 }
 0x61b   : > { %v3696_v18 = vpop.eup %3695  ;;  %1947 = vadd.xlane.f32.xlu0 %v1946_v26  ;;  %3472 = vmatmul.mubr.msk.bf16.gmra.mrb[68].mxu1 %vm277_vm0, %v4246_v37 }
 0x61c   : > { %v1949_v45 = vsel %vm633_vm2, %v3696_v18, 0.0  ;;  %v1960_v30 = vpack.c.bf16 %v3696_v18, %v3694_v29  ;;  %3491 = vmatprep.mubr.msk.bf16.mxu1 %vm277_vm0, %v4231_v39 }
 0x61d   : > { %v3698_v47 = vpop.eup %3697  ;;  %1950 = vadd.xlane.f32.xlu1 %v1949_v45 }
 0x61e   : > { %v1952_v16 = vsel %vm633_vm2, %v3698_v47, 0.0 }
 0x61f   : > { %v3700_v22 = vpop.eup %3699  ;;  %1953 = vadd.xlane.f32.xlu0 %v1952_v16 }
 0x620   : > { %v1955_v23 = vsel %vm633_vm2, %v3700_v22, 0.0  ;;  %v1961_v12 = vpack.c.bf16 %v3700_v22, %v3698_v47 }
 0x621   : > { %1956 = vadd.xlane.f32.xlu1 %v1955_v23 }
 0x6a0   : > { %v1936_v62 = vpop.xlane.xlu0 %1935 }
 0x6a1   : > { %3701 = vrcp.f32 %v1936_v62  ;;  %v3036_v62 = vld [vmem:[%s4395_s2 + $0x7] ss:$0 sm:$0xff] }
 0x6a2   : > { %v1939_v63 = vpop.xlane.xlu1 %1938 }
 0x6a4   : > { %v1942_v0 = vpop.xlane.xlu0 %1941 }
 0x6a5   : > { %3703 = vrcp.f32 %v1942_v0 }
 0x6a6   : > { %v1945_v1 = vpop.xlane.xlu1 %1944 }
 0x6a7   : > { %3705 = vrcp.f32 %v1945_v1 }
 0x6a8   : > { %v1948_v34 = vpop.xlane.xlu0 %1947  ;;  %3707 = vrcp.f32 %v1939_v63 }
 0x6a9   : > { %3709 = vrcp.f32 %v1948_v34 }
 0x6aa   : > { %v1951_v42 = vpop.xlane.xlu1 %1950 }
 0x6ab   : > { %v3702_v44 = vpop.eup %3701 }
 0x6ac   : > { %v1954_v10 = vpop.xlane.xlu0 %1953 }
 0x6ad   : > { %3711 = vrcp.f32 %v1954_v10 }
 0x6ae   : > { %v1957_v2 = vpop.xlane.xlu1 %1956 }
 0x6af   : > { %3713 = vrcp.f32 %v1957_v2  ;;  %v3704_v4 = vpop.eup %3703 }
 0x6b0   : > { %3715 = vrcp.f32 %v1951_v42 }
 0x6b1   : > { %v3706_v13 = vpop.eup %3705 }
 0x6b2   : > { %v3708_v15 = vpop.eup %3707 }
 0x6b3   : > { %v3710_v14 = vpop.eup %3709 }
 0x6b7   : > { %v3712_v26 = vpop.eup %3711 }
 0x6b9   : > { %v3714_v45 = vpop.eup %3713 }
 0x6ba   : > { %v3716_v47 = vpop.eup %3715 }
 0x6ce   : > { %v3415_v25 = vpop.f32.mrb[48].mxu0 }
 0x6cf   : > { %v1758_v5 = vpop.f32.mrb[49].mxu0  ;;  %v1767_v21 = vadd.f32 %v3415_v25, %v2999_v3 }
 0x6d0   : > { %v3416_v7 = vpop.f32.mrb[50].mxu0  ;;  %v1759_v19 = vadd.f32 %v2999_v3, %v1758_v5 }
 0x6d1   : > { %v1770_v32 = vadd.f32 %v3416_v7, %v2999_v3  ;;  %v1761_v20 = vpop.f32.mrb[51].mxu0 }
 0x6d2   : > { %v1762_v6 = vadd.f32 %v2999_v3, %v1761_v20 }
 0x6d3   : > { %v1963_v36 = vpack.c.bf16 %v1770_v32, %v1767_v21  ;;  %v3024_v21 = vld [vmem:[%s4395_s2 + $0x3] ss:$0 sm:$0xff] }
 0x6d4   : > { %v1962_v35 = vpack.c.bf16 %v1762_v6, %v1759_v19 }
 0x6d6   : > { %v3419_v31 = vpop.f32.mrb[52].mxu0  ;;  %3437 = vmatprep.subr.bf16.mxu0 %v1962_v35 }
 0x6d7   : > { %v1774_v38 = vpop.f32.mrb[53].mxu0  ;;  %3438 = vmatpush3.bf16.msra.mxu0 %v1962_v35  ;;  %v1783_v49 = vadd.f32 %v3419_v31, %v2999_v3 }
 0x6d8   : > { %v3420_v17 = vpop.f32.mrb[54].mxu0  ;;  %3439 = vmatprep.subr.bf16.mxu0 %v1963_v36  ;;  %v1775_v55 = vadd.f32 %v2999_v3, %v1774_v38 }
 0x6d9   : > { %v1786_v51 = vadd.f32 %v3420_v17, %v2999_v3  ;;  %v1777_v54 = vpop.f32.mrb[55].mxu0 }
 0x6da   : > { %v1778_v56 = vadd.f32 %v2999_v3, %v1777_v54 }
 0x6db   : > { %v1965_v40 = vpack.c.bf16 %v1786_v51, %v1783_v49  ;;  %3440 = vmatpush3.bf16.msra.mxu0 %v1963_v36 }
 0x6dc   : > { %v1964_v53 = vpack.c.bf16 %v1778_v56, %v1775_v55 }
 0x6de   : > { %3441 = vmatprep.subr.bf16.mxu0 %v1964_v53 }
 0x6df   : > { %3442 = vmatpush3.bf16.msra.mxu0 %v1964_v53 }
 0x6e0   : > { %3443 = vmatprep.subr.bf16.mxu0 %v1965_v40 }
 0x6e3   : > { %3444 = vmatpush3.bf16.msra.mxu0 %v1965_v40 }
 0x6e4   : > { %3579 = vmatprep.subr.msk.bf16.mxu0 %vm1370_vm3, %v3014_v57 }
 0x6e6   : > { %3446 = vmatmul.mubr.msk.bf16.vlgmr.msra.gmra.mrb[56].mxu0 %vm633_vm2, %v1959_v27  ;;  %v3616_v27 = vld [vmem:[%s4394_s1 + $0x78] sm:$0xff]   ;;  %v3469_v7 = vpop.f32.mrb[64].mxu1 }
 0x6e7   : > { %3449 = vmatprep.mubr.msk.bf16.mxu0 %vm633_vm2, %v1960_v30  ;;  %3454 = vmatpush3.bf16.msra.mxu0 %v2078_v58  ;;  %v4313_v32 = vadd.f32 %v3469_v7, %v3024_v21  ;;  %v2212_v20 = vpop.f32.mrb[65].mxu1 }
 0x6e8   : > { %3475 = vmatprep.subr.bf16.mxu0 %v3615_v59  ;;  %v2213_v19 = vadd.f32 %v3024_v21, %v2212_v20  ;;  %v3470_v6 = vpop.f32.mrb[66].mxu1 }
 0x6e9   : > { %v2215_v36 = vpop.f32.mrb[67].mxu1 }
 0x6ea   : > { %v2216_v35 = vadd.f32 %v3024_v21, %v2215_v36 }
 0x6ec   : > { %v2423_v38 = vpack.c.bf16 %v2216_v35, %v2213_v19 }
 0x6ee   : > { %3450 = vmatmul.mubr.msk.bf16.gmra.mrb[60].mxu0 %vm633_vm2, %v1961_v12  ;;  %v3473_v17 = vpop.f32.mrb[68].mxu1 }
 0x6ef   : > { %v2237_v49 = vadd.f32 %v3473_v17, %v3024_v21  ;;  %v2228_v51 = vpop.f32.mrb[69].mxu1 }
 0x6f0   : > { %v2229_v54 = vadd.f32 %v3024_v21, %v2228_v51  ;;  %v3474_v55 = vpop.f32.mrb[70].mxu1 }
 0x6f1   : > { %v2240_v56 = vadd.f32 %v3474_v55, %v3024_v21  ;;  %v2231_v40 = vpop.f32.mrb[71].mxu1 }
 0x6f2   : > { %v2232_v53 = vadd.f32 %v3024_v21, %v2231_v40 }
 0x6f3   : > { %v2426_v57 = vpack.c.bf16 %v2240_v56, %v2237_v49 }
 0x6f4   : > { %v2425_v58 = vpack.c.bf16 %v2232_v53, %v2229_v54 }
 0x7b9   : > { %v3447_v33 = vpop.f32.mrb[56].mxu0 }
 0x7ba   : > { %v2012_v8 = vpop.f32.mrb[57].mxu0  ;;  %v2053_v41 = vmul.f32 %v3704_v4, %v3447_v33 }
 0x7bb   : > { %v3448_v9 = vpop.f32.mrb[58].mxu0  ;;  %v2051_v28 = vmul.f32 %v3702_v44, %v2012_v8 }
 0x7bc   : > { %v2054_v11 = vmul.f32 %v3706_v13, %v3448_v9  ;;  %v2015_v43 = vpop.f32.mrb[59].mxu0 }
 0x7bd   : > { %v2052_v46 = vmul.f32 %v3708_v15, %v2015_v43 }
 0x7be   : > { %v2060_v24 = vpack.c.bf16 %v2054_v11, %v2053_v41 }
 0x7bf   : > { %v2059_v48 = vpack.c.bf16 %v2052_v46, %v2051_v28 }
 0x7c1   : > { %v3451_v29 = vpop.f32.mrb[60].mxu0  ;;  %3455 = vmatprep.mubr.msk.bf16.mxu0 %vm543_vm1, %v2059_v48  ;;  %v3048_v48 = vld [vmem:[%s4395_s2 + $0xb] ss:$0 sm:$0xff] }
 0x7c2   : > { %v2028_v18 = vpop.f32.mrb[61].mxu0  ;;  %3456 = vmatmul.mubr.msk.bf16.vlgmr.msra.gmra.mrb[40].mxu0 %vm543_vm1, %v2060_v24  ;;  %v2057_v16 = vmul.f32 %v3712_v26, %v3451_v29 }
 0x7c3   : > { %v3452_v30 = vpop.f32.mrb[62].mxu0  ;;  %3476 = vmatpush3.bf16.msra.mxu0 %v3615_v59  ;;  %v2055_v12 = vmul.f32 %v3710_v14, %v2028_v18  ;;  %v3619_v59 = vld [vmem:[%s4394_s1 + $0xb0] sm:$0xff]  }
 0x7c4   : > { %v2058_v22 = vmul.f32 %v3714_v45, %v3452_v30  ;;  %v2031_v23 = vpop.f32.mrb[63].mxu0  ;;  %3477 = vmatprep.subr.bf16.mxu0 %v3616_v27  ;;  %3487 = vmatprep.subr.bf16.mxu1 %v3619_v59 }
 0x7c5   : > { %v2056_v25 = vmul.f32 %v3716_v47, %v2031_v23  ;;  %3488 = vmatpush3.bf16.msra.mxu1 %v3619_v59 }
 0x7c6   : > { %v2062_v3 = vpack.c.bf16 %v2058_v22, %v2057_v16  ;;  %3489 = vmatprep.subr.bf16.mxu1 %v3620_v60 }
 0x7c7   : > { %v2061_v5 = vpack.c.bf16 %v2056_v25, %v2055_v12  ;;  %3478 = vmatpush3.bf16.msra.mxu0 %v3616_v27 }
 0x7c9   : > { %3459 = vmatprep.mubr.msk.bf16.mxu0 %vm543_vm1, %v2061_v5  ;;  %3490 = vmatpush3.bf16.msra.mxu1 %v3620_v60 }
 0x7ca   : > { %3460 = vmatmul.mubr.msk.bf16.gmra.mrb[44].mxu0 %vm543_vm1, %v2062_v3 }
 0x7cb   : > { %3479 = vmatprep.mubr.msk.bf16.mxu0 %vm277_vm0, %v4231_v39  ;;  %v2224_v39 = vadd.f32 %v3470_v6, %v3024_v21 }
 0x7cc   : > { %3492 = vmatmul.mubr.msk.bf16.vlgmr.msra.gmra.mrb[72].mxu1 %vm277_vm0, %v4236_v52 }
 0x7cd   : > { %v2424_v31 = vpack.c.bf16 %v2224_v39, %v4313_v32  ;;  %3495 = vmatprep.mubr.msk.bf16.mxu1 %vm277_vm0, %v4241_v50 }
 0x7d2   : > { %3480 = vmatmul.mubr.msk.bf16.vlgmr.msra.gmra.mrb[64].mxu0 %vm277_vm0, %v4236_v52 }
 0x7d3   : > { %3483 = vmatprep.mubr.msk.bf16.mxu0 %vm277_vm0, %v4241_v50 }
 0x7d4   : > { %3496 = vmatmul.mubr.msk.bf16.gmra.mrb[76].mxu1 %vm277_vm0, %v4246_v37 }
 0x7da   : > { %3484 = vmatmul.mubr.msk.bf16.gmra.mrb[68].mxu0 %vm277_vm0, %v4246_v37 }
 0x7db   : > { %3507 = vmatprep.mubr.msk.bf16.mxu0 %vm543_vm1, %v2423_v38 }
 0x89f   : > { %v3493_v27 = vpop.f32.mrb[72].mxu1 }
 0x8a0   : > { %v2401_v14 = vadd.f32 %v3493_v27, %v3048_v48  ;;  %v2392_v29 = vpop.f32.mrb[73].mxu1 }
 0x8a1   : > { %v2393_v26 = vadd.f32 %v3048_v48, %v2392_v29  ;;  %v3494_v18 = vpop.f32.mrb[74].mxu1 }
 0x8a2   : > { %v2404_v45 = vadd.f32 %v3494_v18, %v3048_v48  ;;  %v2395_v30 = vpop.f32.mrb[75].mxu1 }
 0x8a3   : > { %v2396_v47 = vadd.f32 %v3048_v48, %v2395_v30 }
 0x8a4   : > { %v2597_v16 = vpack.c.bf16 %v2404_v45, %v2401_v14 }
 0x8a5   : > { %v3481_v61 = vpop.f32.mrb[64].mxu0  ;;  %v2596_v22 = vpack.c.bf16 %v2396_v47, %v2393_v26 }
 0x8a6   : > { %v2302_v63 = vpop.f32.mrb[65].mxu0  ;;  %v2311_v1 = vadd.f32 %v3481_v61, %v3036_v62 }
 0x8a7   : > { %v3482_v0 = vpop.f32.mrb[66].mxu0  ;;  %v2303_v10 = vadd.f32 %v3036_v62, %v2302_v63  ;;  %v3497_v23 = vpop.f32.mrb[76].mxu1  ;;  %3515 = vmatprep.subr.bf16.mxu1 %v2596_v22 }
 0x8a8   : > { %v2314_v34 = vadd.f32 %v3482_v0, %v3036_v62  ;;  %v2305_v42 = vpop.f32.mrb[67].mxu0  ;;  %3516 = vmatpush3.bf16.msra.mxu1 %v2596_v22  ;;  %v2408_v49 = vpop.f32.mrb[77].mxu1  ;;  %v2417_v54 = vadd.f32 %v3497_v23, %v3048_v48 }
 0x8a9   : > { %v2306_v2 = vadd.f32 %v3036_v62, %v2305_v42  ;;  %3517 = vmatprep.subr.bf16.mxu1 %v2597_v16  ;;  %v3498_v51 = vpop.f32.mrb[78].mxu1  ;;  %v2409_v56 = vadd.f32 %v3048_v48, %v2408_v49 }
 0x8aa   : > { %v2428_v44 = vpack.c.bf16 %v2314_v34, %v2311_v1  ;;  %v2411_v55 = vpop.f32.mrb[79].mxu1  ;;  %v2420_v53 = vadd.f32 %v3498_v51, %v3048_v48 }
 0x8ab   : > { %v2427_v52 = vpack.c.bf16 %v2306_v2, %v2303_v10  ;;  %v2412_v40 = vadd.f32 %v3048_v48, %v2411_v55 }
 0x8ac   : > { %v2447_v28 = vsel %vm543_vm1, %v2428_v44, 0  ;;  %3518 = vmatpush3.bf16.msra.mxu1 %v2597_v16 }
 0x8ad   : > { %3580 = vmatprep.subr.msk.bf16.mxu0 %vm543_vm1, %v2427_v52  ;;  %v2444_v50 = vsel %vm543_vm1, %v2427_v52, 0  ;;  %v3485_v33 = vpop.f32.mrb[68].mxu0 }
 0x8ae   : > { %3500 = vmatpush3.bf16.xpose.msra.mxu0 %v2444_v50  ;;  %v2327_v37 = vadd.f32 %v3485_v33, %v3036_v62  ;;  %v2318_v4 = vpop.f32.mrb[69].mxu0 }
 0x8af   : > { %3581 = vmatprep.subr.msk.bf16.mxu0 %vm543_vm1, %v2428_v44  ;;  %v2319_v8 = vadd.f32 %v3036_v62, %v2318_v4  ;;  %v3486_v13 = vpop.f32.mrb[70].mxu0 }
 0x8b0   : > { %v2330_v9 = vadd.f32 %v3486_v13, %v3036_v62  ;;  %v2321_v15 = vpop.f32.mrb[71].mxu0 }
 0x8b1   : > { %v2322_v41 = vadd.f32 %v3036_v62, %v2321_v15 }
 0x8b2   : > { %v2430_v11 = vpack.c.bf16 %v2330_v9, %v2327_v37 }
 0x8b3   : > { %v2429_v43 = vpack.c.bf16 %v2322_v41, %v2319_v8 }
 0x8b4   : > { %v2453_v24 = vsel %vm543_vm1, %v2430_v11, 0 }
 0x8b5   : > { %v2450_v46 = vsel %vm543_vm1, %v2429_v43, 0 }
 0x8b6   : > { %3502 = vmatpush3.bf16.xpose.msra.mxu0 %v2447_v28 }
 0x8b7   : > { %3582 = vmatprep.subr.msk.bf16.mxu0 %vm543_vm1, %v2429_v43 }
 0x8be   : > { %3504 = vmatpush3.bf16.xpose.msra.mxu0 %v2450_v46 }
 0x8bf   : > { %3583 = vmatprep.subr.msk.bf16.mxu0 %vm543_vm1, %v2430_v11 }
 0x8c6   : > { %3506 = vmatpush3.bf16.xpose.msra.mxu0 %v2453_v24 }
 0x8cd   : > { %3508 = vmatmul.mubr.msk.bf16.vlgmr.msra.gmra.mrb[72].mxu0 %vm543_vm1, %v2424_v31 }
 0x8ce   : > { %3511 = vmatprep.mubr.msk.bf16.mxu0 %vm543_vm1, %v2425_v58  ;;  %v2599_v58 = vpack.c.bf16 %v2420_v53, %v2417_v54 }
 0x8d5   : > { %3512 = vmatmul.mubr.msk.bf16.gmra.mrb[76].mxu0 %vm543_vm1, %v2426_v57  ;;  %v2598_v57 = vpack.c.bf16 %v2412_v40, %v2409_v56 }
 0x8d7   : > { %3519 = vmatprep.subr.bf16.mxu1 %v2598_v57 }
 0x8d8   : > { %3520 = vmatpush3.bf16.msra.mxu1 %v2598_v57 }
 0x8d9   : > { %3521 = vmatprep.subr.bf16.mxu1 %v2599_v58 }
 0x8dc   : > { %3522 = vmatpush3.bf16.msra.mxu1 %v2599_v58 }
 0x9a0   : > { %v3509_v12 = vpop.f32.mrb[72].mxu0 }
 0x9a1   : > { %v2489_v25 = vpop.f32.mrb[73].mxu0  ;;  %v2526_v32 = vsel %vm633_vm2, %v3509_v12, -inf }
 0x9a2   : > { %v3510_v3 = vpop.f32.mrb[74].mxu0  ;;  %v2520_v5 = vsel %vm633_vm2, %v2489_v25, -inf }
 0x9a3   : > { %2521 = vmax.xlane.f32.xlu0 %v2520_v5  ;;  %v2492_v7 = vpop.f32.mrb[75].mxu0  ;;  %v2529_v19 = vsel %vm633_vm2, %v3510_v3, -inf }
 0x9a4   : > { %v2523_v21 = vsel %vm633_vm2, %v2492_v7, -inf }
 0x9a5   : > { %2524 = vmax.xlane.f32.xlu1 %v2523_v21  ;;  %v3063_v21 = vld [vmem:[%s4396_s3 + $0xc] sm:$0xf] }
 0x9a6   : > { %3584 = vmatprep.subr.msk.bf16.mxu0 %vm1370_vm3, %v3063_v21 }
 0x9a7   : > { %2527 = vmax.xlane.f32.xlu0 %v2526_v32  ;;  %v2712_v32 = vsel %vm1370_vm3, %v3063_v21, 0 }
 0x9a8   : > { %v3513_v20 = vpop.f32.mrb[76].mxu0  ;;  %3532 = vmatpush3.bf16.msra.mxu0 %v2712_v32 }
 0x9a9   : > { %2530 = vmax.xlane.f32.xlu1 %v2529_v19  ;;  %v2505_v6 = vpop.f32.mrb[77].mxu0  ;;  %v2538_v38 = vsel %vm633_vm2, %v3513_v20, -inf }
 0x9aa   : > { %v3514_v39 = vpop.f32.mrb[78].mxu0  ;;  %v2532_v36 = vsel %vm633_vm2, %v2505_v6, -inf }
 0x9ab   : > { %2533 = vmax.xlane.f32.xlu0 %v2532_v36  ;;  %v2508_v35 = vpop.f32.mrb[79].mxu0  ;;  %v2541_v17 = vsel %vm633_vm2, %v3514_v39, -inf }
 0x9ac   : > { %v2535_v31 = vsel %vm633_vm2, %v2508_v35, -inf }
 0x9ad   : > { %2536 = vmax.xlane.f32.xlu1 %v2535_v31 }
 0x9af   : > { %2539 = vmax.xlane.f32.xlu0 %v2538_v38 }
 0x9b1   : > { %2542 = vmax.xlane.f32.xlu1 %v2541_v17 }
 0xa30   : > { %v2522_v59 = vpop.xlane.xlu0 %2521 }
 0xa31   : > { %v2544_v60 = vsub.f32 %v2489_v25, %v2522_v59 }
 0xa32   : > { %v2525_v61 = vpop.xlane.xlu1 %2524 }
 0xa33   : > { %v2552_v62 = vmul.f32 1.442695, %v2544_v60  ;;  %v2545_v63 = vsub.f32 %v2492_v7, %v2525_v61 }
 0xa34   : > { %v2528_v0 = vpop.xlane.xlu0 %2527 }
 0xa35   : > { %3717 = vpow2.f32 %v2552_v62  ;;  %v2554_v1 = vmul.f32 1.442695, %v2545_v63  ;;  %v2546_v34 = vsub.f32 %v3509_v12, %v2528_v0 }
 0xa36   : > { %v2531_v42 = vpop.xlane.xlu1 %2530 }
 0xa37   : > { %3719 = vpow2.f32 %v2554_v1  ;;  %v2556_v10 = vmul.f32 1.442695, %v2546_v34  ;;  %v2547_v2 = vsub.f32 %v3510_v3, %v2531_v42 }
 0xa38   : > { %v2534_v44 = vpop.xlane.xlu0 %2533 }
 0xa39   : > { %3721 = vpow2.f32 %v2556_v10  ;;  %v2558_v52 = vmul.f32 1.442695, %v2547_v2  ;;  %v2548_v50 = vsub.f32 %v2505_v6, %v2534_v44 }
 0xa3a   : > { %v2537_v33 = vpop.xlane.xlu1 %2536 }
 0xa3b   : > { %3723 = vpow2.f32 %v2558_v52  ;;  %v2560_v37 = vmul.f32 1.442695, %v2548_v50  ;;  %v2549_v4 = vsub.f32 %v2508_v35, %v2537_v33 }
 0xa3c   : > { %v2540_v8 = vpop.xlane.xlu0 %2539 }
 0xa3d   : > { %3725 = vpow2.f32 %v2560_v37  ;;  %v2562_v13 = vmul.f32 1.442695, %v2549_v4  ;;  %v2550_v9 = vsub.f32 %v3513_v20, %v2540_v8 }
 0xa3e   : > { %v2543_v15 = vpop.xlane.xlu1 %2542 }
 0xa3f   : > { %v3718_v41 = vpop.eup %3717  ;;  %3727 = vpow2.f32 %v2562_v13  ;;  %v2564_v11 = vmul.f32 1.442695, %v2550_v9  ;;  %v2551_v43 = vsub.f32 %v3514_v39, %v2543_v15  ;;  %v3068_v13 = vld [vmem:[%s4397_s4] ss:$0 sm:$0xff] }
 0xa40   : > { %v2568_v28 = vsel %vm633_vm2, %v3718_v41, 0.0 }
 0xa41   : > { %v3720_v46 = vpop.eup %3719  ;;  %3729 = vpow2.f32 %v2564_v11  ;;  %v2566_v24 = vmul.f32 1.442695, %v2551_v43  ;;  %2569 = vadd.xlane.f32.xlu0 %v2568_v28 }
 0xa42   : > { %v2571_v48 = vsel %vm633_vm2, %v3720_v46, 0.0  ;;  %v2592_v27 = vpack.c.bf16 %v3720_v46, %v3718_v41 }
 0xa43   : > { %v3722_v14 = vpop.eup %3721  ;;  %3731 = vpow2.f32 %v2566_v24  ;;  %2572 = vadd.xlane.f32.xlu1 %v2571_v48 }
 0xa44   : > { %3523 = vmatprep.mubr.msk.bf16.mxu1 %vm633_vm2, %v2592_v27  ;;  %v2574_v29 = vsel %vm633_vm2, %v3722_v14, 0.0 }
 0xa45   : > { %v3724_v26 = vpop.eup %3723  ;;  %2575 = vadd.xlane.f32.xlu0 %v2574_v29 }
 0xa46   : > { %v2593_v18 = vpack.c.bf16 %v3724_v26, %v3722_v14  ;;  %v2577_v45 = vsel %vm633_vm2, %v3724_v26, 0.0 }
 0xa47   : > { %v3726_v30 = vpop.eup %3725  ;;  %2578 = vadd.xlane.f32.xlu1 %v2577_v45 }
 0xa48   : > { %3524 = vmatmul.mubr.msk.bf16.vlgmr.msra.gmra.mrb[80].mxu1 %vm633_vm2, %v2593_v18  ;;  %v2580_v47 = vsel %vm633_vm2, %v3726_v30, 0.0 }
 0xa49   : > { %v3728_v16 = vpop.eup %3727  ;;  %2581 = vadd.xlane.f32.xlu0 %v2580_v47 }
 0xa4a   : > { %v2583_v22 = vsel %vm633_vm2, %v3728_v16, 0.0  ;;  %v2594_v23 = vpack.c.bf16 %v3728_v16, %v3726_v30 }
 0xa4b   : > { %v3730_v12 = vpop.eup %3729  ;;  %2584 = vadd.xlane.f32.xlu1 %v2583_v22 }
 0xa4c   : > { %3527 = vmatprep.mubr.msk.bf16.mxu1 %vm633_vm2, %v2594_v23  ;;  %v2586_v25 = vsel %vm633_vm2, %v3730_v12, 0.0 }
 0xa4d   : > { %v3732_v3 = vpop.eup %3731  ;;  %2587 = vadd.xlane.f32.xlu0 %v2586_v25 }
 0xa4e   : > { %v2589_v5 = vsel %vm633_vm2, %v3732_v3, 0.0  ;;  %v2595_v7 = vpack.c.bf16 %v3732_v3, %v3730_v12 }
 0xa4f   : > { %2590 = vadd.xlane.f32.xlu1 %v2589_v5 }
 0xa50   : > { %3528 = vmatmul.mubr.msk.bf16.gmra.mrb[84].mxu1 %vm633_vm2, %v2595_v7 }
 0xace   : > { %v2570_v20 = vpop.xlane.xlu0 %2569 }
 0xacf   : > { %3733 = vrcp.f32 %v2570_v20 }
 0xad0   : > { %v2573_v19 = vpop.xlane.xlu1 %2572 }
 0xad2   : > { %v2576_v6 = vpop.xlane.xlu0 %2575 }
 0xad3   : > { %3735 = vrcp.f32 %v2576_v6 }
 0xad4   : > { %v2579_v39 = vpop.xlane.xlu1 %2578 }
 0xad5   : > { %3737 = vrcp.f32 %v2579_v39 }
 0xad6   : > { %v2582_v36 = vpop.xlane.xlu0 %2581  ;;  %3739 = vrcp.f32 %v2573_v19 }
 0xad7   : > { %3741 = vrcp.f32 %v2582_v36 }
 0xad8   : > { %v2585_v35 = vpop.xlane.xlu1 %2584 }
 0xad9   : > { %v3734_v17 = vpop.eup %3733 }
 0xada   : > { %v2588_v31 = vpop.xlane.xlu0 %2587 }
 0xadb   : > { %3743 = vrcp.f32 %v2588_v31 }
 0xadc   : > { %v2591_v38 = vpop.xlane.xlu1 %2590 }
 0xadd   : > { %3745 = vrcp.f32 %v2591_v38  ;;  %v3736_v51 = vpop.eup %3735 }
 0xade   : > { %3747 = vrcp.f32 %v2585_v35 }
 0xadf   : > { %v3738_v55 = vpop.eup %3737 }
 0xae0   : > { %v3740_v40 = vpop.eup %3739 }
 0xae1   : > { %v3742_v63 = vpop.eup %3741 }
 0xae5   : > { %v3744_v1 = vpop.eup %3743 }
 0xae7   : > { %v3746_v42 = vpop.eup %3745 }
 0xae8   : > { %v3748_v2 = vpop.eup %3747 }
 0xb1b   : > { %v3525_v49 = vpop.f32.mrb[80].mxu1 }
 0xb1c   : > { %v2646_v54 = vpop.f32.mrb[81].mxu1  ;;  %v2687_v53 = vmul.f32 %v3736_v51, %v3525_v49 }
 0xb1d   : > { %v3526_v56 = vpop.f32.mrb[82].mxu1  ;;  %v2685_v59 = vmul.f32 %v3734_v17, %v2646_v54 }
 0xb1e   : > { %v2688_v57 = vmul.f32 %v3738_v55, %v3526_v56  ;;  %v2649_v58 = vpop.f32.mrb[83].mxu1 }
 0xb1f   : > { %v2686_v60 = vmul.f32 %v3740_v40, %v2649_v58 }
 0xb20   : > { %v2694_v61 = vpack.c.bf16 %v2688_v57, %v2687_v53 }
 0xb21   : > { %v2693_v62 = vpack.c.bf16 %v2686_v60, %v2685_v59 }
 0xb23   : > { %v3529_v0 = vpop.f32.mrb[84].mxu1  ;;  %3533 = vmatprep.mubr.msk.bf16.mxu0 %vm543_vm1, %v2693_v62 }
 0xb24   : > { %v2662_v34 = vpop.f32.mrb[85].mxu1  ;;  %3534 = vmatmul.mubr.msk.bf16.vlgmr.msra.gmra.mrb[40].mxu0 %vm543_vm1, %v2694_v61  ;;  %v2691_v44 = vmul.f32 %v3744_v1, %v3529_v0 }
 0xb25   : > { %v3530_v10 = vpop.f32.mrb[86].mxu1  ;;  %v2689_v33 = vmul.f32 %v3742_v63, %v2662_v34 }
 0xb26   : > { %v2692_v52 = vmul.f32 %v3746_v42, %v3530_v10  ;;  %v2665_v50 = vpop.f32.mrb[87].mxu1 }
 0xb27   : > { %v2690_v37 = vmul.f32 %v3748_v2, %v2665_v50 }
 0xb28   : > { %v2696_v4 = vpack.c.bf16 %v2692_v52, %v2691_v44 }
 0xb29   : > { %v2695_v8 = vpack.c.bf16 %v2690_v37, %v2689_v33 }
 0xb2b   : > { %3537 = vmatprep.mubr.msk.bf16.mxu0 %vm543_vm1, %v2695_v8 }
 0xb2c   : > { %3538 = vmatmul.mubr.msk.bf16.gmra.mrb[44].mxu0 %vm543_vm1, %v2696_v4 }
 0xbf7   : > { %v3535_v9 = vpop.f32.mrb[40].mxu0 }
 0xbf8   : > { %v2796_v15 = vadd.f32 %v3535_v9, %v3068_v13  ;;  %v2748_v41 = vpop.f32.mrb[41].mxu0 }
 0xbf9   : > { %v2794_v11 = vadd.f32 %v3068_v13, %v2748_v41  ;;  %v3536_v43 = vpop.f32.mrb[42].mxu0 }
 0xbfa   : > { %2804 = vst.msk [vmem:[%s224_s16 + $0x10] sm:$0xff] %vm277_vm0, %v2796_v15  ;;  %v2797_v28 = vadd.f32 %v3536_v43, %v3068_v13  ;;  %v2751_v46 = vpop.f32.mrb[43].mxu0 }
 0xbfb   : > { %2802 = vst.msk [vmem:[%s224_s16] sm:$0xff] %vm277_vm0, %v2794_v11  ;;  %v2795_v24 = vadd.f32 %v3068_v13, %v2751_v46 }
 0xbfc   : > { %2805 = vst.msk [vmem:[%s224_s16 + $0x18] sm:$0xff] %vm277_vm0, %v2797_v28 }
 0xbfd   : > { %2803 = vst.msk [vmem:[%s224_s16 + $0x8] sm:$0xff] %vm277_vm0, %v2795_v24 }
 0xbff   : > { %v3539_v48 = vpop.f32.mrb[44].mxu0 }
 0xc00   : > { %v2800_v27 = vadd.f32 %v3539_v48, %v3068_v13  ;;  %v2764_v14 = vpop.f32.mrb[45].mxu0 }
 0xc01   : > { %v2798_v29 = vadd.f32 %v3068_v13, %v2764_v14  ;;  %v3540_v26 = vpop.f32.mrb[46].mxu0 }
 0xc02   : > { %2808 = vst.msk [vmem:[%s224_s16 + $0x30] sm:$0xff] %vm277_vm0, %v2800_v27  ;;  %v2801_v18 = vadd.f32 %v3540_v26, %v3068_v13  ;;  %v2767_v45 = vpop.f32.mrb[47].mxu0 }
 0xc03   : > { %2806 = vst.msk [vmem:[%s224_s16 + $0x20] sm:$0xff] %vm277_vm0, %v2798_v29  ;;  %v2799_v30 = vadd.f32 %v3068_v13, %v2767_v45 }
 0xc04   : > { %2809 = vst.msk [vmem:[%s224_s16 + $0x38] sm:$0xff] %vm277_vm0, %v2801_v18 }
 0xc05   : > { %2807 = vst.msk [vmem:[%s224_s16 + $0x28] sm:$0xff] %vm277_vm0, %v2799_v30 }
 0xc06 PF: > { %s15_s18 = sadd.s32 1, %s3759_s18  }
 0xc07   : > { %p12_p4 = scmp.ge.s32.totalorder %s15_s18, 4  }
 0xc09   :  { %14 = sbr.rel (!%p12_p4) target bundleno = 1 (0x1), region = 95 }

</bundles_post_ra>
